<compile_context>
chip_gen: v5e
topology: v5e:2x2
jax: 0.10.0
libtpu: 0.0.40
codegen_flags: <defaults>
</compile_context>

<pallas_src>
import math

import numpy as np
import jax
import jax.numpy as jnp
from jax import lax
from jax.experimental import pallas as pl
from jax.experimental.pallas import tpu as pltpu

# Small, forward-consistent shapes (real model: H=768, FF=3072, V=250002, 12 layers).
B, S, H, V = 2, 8, 128, 512
FF = 4 * H
V_TILE = 128            # production: ~1024 (v7x 64 MiB VMEM) .. 2048-4096 (v5e/v6e)
NUM_LG = 2
LN_EPS = 1e-5
NEG_INF = -1e9

ENC_KEYS = ('wqkv', 'bqkv', 'wo', 'bo', 'g1', 'be1',
            'w1', 'b1', 'w2', 'b2', 'g2', 'be2')


# ----------------------------- shared math helpers -----------------------------
# Plain jnp functions used both inside the Pallas kernels (Mosaic) and by the pure-JAX
# reference (XLA): the kernels are semantically equivalent by construction; only the
# reciprocal differs (approx EUP reciprocal in the kernels, exact in the reference).

def _mm_bf16(x, w):
    """y = x @ w.T with bf16 MXU operands and f32 accumulation (w: [out, in])."""
    return lax.dot_general(
        x.astype(jnp.bfloat16), w.astype(jnp.bfloat16),
        (((x.ndim - 1,), (1,)), ((), ())),
        preferred_element_type=jnp.float32)


def _linear(x, w, b):
    # PyTorch nn.Linear: y = x @ W.T + b   (W: [out, in]); bias added in f32.
    return _mm_bf16(x, w) + b


def _layernorm(x, g, b):
    mu = jnp.mean(x, axis=-1, keepdims=True)
    var = jnp.mean((x - mu) ** 2, axis=-1, keepdims=True)
    return (x - mu) * lax.rsqrt(var + LN_EPS) * g + b


def _encoder_math(x, bias, e, recip):
    """Single-head transformer encoder layer over the whole batch.

    x: [B, S, H] f32; bias: [B, 1, S] additive key mask.  B*S is folded into the
    sublane (row) dim for the fused-QKV and FFN matmuls (one MXU pass per weight).
    """
    Bn, Sn, Hn = x.shape
    xf = x.reshape(Bn * Sn, Hn)
    qkv = _linear(xf, e['wqkv'], e['bqkv'])                       # fused QKV: [B*S, 3H]
    q = qkv[:, :Hn].reshape(Bn, Sn, Hn)
    k = qkv[:, Hn:2 * Hn].reshape(Bn, Sn, Hn)
    v = qkv[:, 2 * Hn:].reshape(Bn, Sn, Hn)
    scores = jnp.einsum('bqh,bkh->bqk', q.astype(jnp.bfloat16), k.astype(jnp.bfloat16),
                        preferred_element_type=jnp.float32)
    scores = scores * (1.0 / math.sqrt(Hn)) + bias
    scores = scores - jnp.max(scores, axis=-1, keepdims=True)
    ez = jnp.exp(scores)
    attn = ez * recip(jnp.sum(ez, axis=-1, keepdims=True))
    ctx = jnp.einsum('bqk,bkh->bqh', attn.astype(jnp.bfloat16), v.astype(jnp.bfloat16),
                     preferred_element_type=jnp.float32)
    h = _layernorm(
        x + _linear(ctx.reshape(Bn * Sn, Hn), e['wo'], e['bo']).reshape(Bn, Sn, Hn),
        e['g1'], e['be1'])
    # TODO(synk): PyTorch nn.GELU defaults to exact erf; tanh approximation used here.
    f = jax.nn.gelu(_linear(h.reshape(Bn * Sn, Hn), e['w1'], e['b1']), approximate=True)
    f = _linear(f, e['w2'], e['b2']).reshape(Bn, Sn, Hn)
    return _layernorm(h + f, e['g2'], e['be2'])


def _head_math(seq, w_cat, b_cat, emb, recip):
    """Fused src/tgt head over one V tile.

    seq: [B, S, H]; w_cat: [2H, H] = concat(W_src, W_tgt); emb: [Vt, H].
    Returns z: [2, B, Vt] (branch 0 = src, 1 = tgt) where
    z[., b, v] = sum_s l[., b, s, v] * softmax_s(l[., b, :, v])
    — the torch transpose(1, 2) + Softmax(dim=-1) weighted-sum reduction.
    """
    Bn, Sn, Hn = seq.shape
    Vt = emb.shape[0]
    p = _linear(seq.reshape(Bn * Sn, Hn), w_cat, b_cat)           # [B*S, 2H]
    p2 = jnp.concatenate([p[:, :Hn], p[:, Hn:]], axis=0)          # [2*B*S, H]
    l = _mm_bf16(p2, emb)                                         # one MXU pass: [2*B*S, Vt]
    l4 = l.reshape(2, Bn, Sn, Vt)
    m = jnp.max(l4, axis=2, keepdims=True)
    ez = jnp.exp(l4 - m)
    sm = ez * recip(jnp.sum(ez, axis=2, keepdims=True))
    return jnp.sum(l4 * sm, axis=2)                               # [2, B, Vt]


def _bce_mean(z, y):
    """BCEWithLogitsLoss(reduction='mean') over flattened logits/labels."""
    z = z.reshape(-1)
    y = y.reshape(-1).astype(jnp.float32)
    return jnp.mean(jnp.maximum(z, 0.0) - z * y + jnp.log1p(jnp.exp(-jnp.abs(z))))


def _approx_recip(t):
    return pl.reciprocal(t, approx=True)      # EUP slot; reference uses exact 1/x


# ----------------------------- Pallas kernels -----------------------------
def encoder_kernel(x_ref, bias_ref,
                   wqkv_ref, bqkv_ref, wo_ref, bo_ref, g1_ref, be1_ref,
                   w1_ref, b1_ref, w2_ref, b2_ref, g2_ref, be2_ref,
                   out_ref):
    # TODO(synk): pretrained 12-layer multi-head xlm-roberta-base replaced by this
    # deterministic 1-layer single-head stand-in (no checkpoint load possible here).
    e = dict(wqkv=wqkv_ref[...], bqkv=bqkv_ref[...], wo=wo_ref[...], bo=bo_ref[...],
             g1=g1_ref[...], be1=be1_ref[...], w1=w1_ref[...], b1=b1_ref[...],
             w2=w2_ref[...], b2=b2_ref[...], g2=g2_ref[...], be2=be2_ref[...])
    out_ref[...] = _encoder_math(x_ref[...], bias_ref[...], e, _approx_recip)


def head_kernel(seq_ref, w_ref, b_ref, emb_ref, out_ref):
    # One align_embedding V tile per grid step; both lg-projection branches fused.
    # (The [B*S, 2H] projection is recomputed per tile; at production it is tiny
    # relative to the emb-tile matmul it feeds.)
    out_ref[...] = _head_math(seq_ref[...], w_ref[...], b_ref[...], emb_ref[...],
                              _approx_recip)


# ----------------------------- pallas_call wrappers -----------------------------
def run_encoder(x, bias, enc):
    # Single invocation (grid=()): whole batch + all weights resident in VMEM once.
    # At production (12 layers, H=768), run one call per layer with bf16 weights and
    # an explicit vmem_limit_bytes, or tile the FFN matmuls over K/N.
    return pl.pallas_call(
        encoder_kernel,
        out_shape=jax.ShapeDtypeStruct(x.shape, jnp.float32),
    )(x, bias, *[enc[k] for k in ENC_KEYS])


def run_head(seq, w_cat, b_cat, emb, *, v_tile=V_TILE):
    Bn, Sn, Hn = seq.shape
    Vn = emb.shape[0]
    assert Vn % v_tile == 0, "pad V to a multiple of V_TILE at production scale"
    n_tiles = Vn // v_tile
    return pl.pallas_call(
        head_kernel,
        out_shape=jax.ShapeDtypeStruct((2, Bn, Vn), jnp.float32),
        grid=(n_tiles,),
        in_specs=[
            pl.BlockSpec((Bn, Sn, Hn), lambda t: (0, 0, 0)),      # seq: resident
            pl.BlockSpec((2 * Hn, Hn), lambda t: (0, 0)),         # W_src || W_tgt (bf16)
            pl.BlockSpec((1, 2 * Hn), lambda t: (0, 0)),          # b_src || b_tgt
            pl.BlockSpec((v_tile, Hn), lambda t: (t, 0)),         # align_embedding tile
        ],
        out_specs=pl.BlockSpec((2, Bn, v_tile), lambda t: (0, 0, t)),   # lane-dense
        compiler_params=pltpu.CompilerParams(
            dimension_semantics=("parallel",),     # v7x: V tiles split across 2 TCs
            vmem_limit_bytes=32 * 1024 * 1024),
    )(seq, w_cat, b_cat, emb)


# ----------------------------- full forward -----------------------------
def cross_lingual_forward(params, input_ids, attention_mask, lg_in, lg_out,
                          labels_src, labels_tgt):
    Bn, Sn = input_ids.shape
    # glue: embedding lookup for the stand-in encoder
    x = params['word_emb'][input_ids].astype(jnp.float32) + params['pos_emb'][None, :Sn, :]
    bias = ((1.0 - attention_mask.astype(jnp.float32)) * NEG_INF)[:, None, :]   # [B,1,S]
    seq = run_encoder(x, bias, params['encoder'])
    # nn.Dropout(0.1) -> identity at inference time.

    # key_to_index['{i}-{j}'] == i * num_lg + j ; fuse the two selected projections.
    idx_src = lg_in * NUM_LG + lg_in
    idx_tgt = lg_in * NUM_LG + lg_out
    w_cat = jnp.concatenate([params['proj_w'][idx_src], params['proj_w'][idx_tgt]], axis=0)
    b_cat = jnp.concatenate([params['proj_b'][idx_src], params['proj_b'][idx_tgt]], axis=1)

    z = run_head(seq, w_cat, b_cat, params['align_embedding'])    # [2, B, V]
    logits_src, logits_tgt = z[0], z[1]

    # BCEWithLogitsLoss: cheap elementwise + scalar reduction over the Pallas logits,
    # kept as a JAX epilogue so the head's V-tile grid axis stays purely parallel.
    loss = _bce_mean(logits_src, labels_src) + _bce_mean(logits_tgt, labels_tgt)
    return loss, (logits_src, logits_tgt)


# ----------------------------- pure-JAX reference -----------------------------
def reference_forward(params, input_ids, attention_mask, lg_in, lg_out,
                      labels_src, labels_tgt):
    Sn = input_ids.shape[1]
    x = params['word_emb'][input_ids].astype(jnp.float32) + params['pos_emb'][None, :Sn, :]
    bias = ((1.0 - attention_mask.astype(jnp.float32)) * NEG_INF)[:, None, :]
    seq = _encoder_math(x, bias, params['encoder'], recip=lambda t: 1.0 / t)

    idx_src = lg_in * NUM_LG + lg_in
    idx_tgt = lg_in * NUM_LG + lg_out
    w_cat = jnp.concatenate([params['proj_w'][idx_src], params['proj_w'][idx_tgt]], axis=0)
    b_cat = jnp.concatenate([params['proj_b'][idx_src], params['proj_b'][idx_tgt]], axis=1)

    z = _head_math(seq, w_cat, b_cat, params['align_embedding'], recip=lambda t: 1.0 / t)
    logits_src, logits_tgt = z[0], z[1]
    loss = _bce_mean(logits_src, labels_src) + _bce_mean(logits_tgt, labels_tgt)
    return loss, (logits_src, logits_tgt)


# ----------------------------- params init -----------------------------
def init_params(key):
    ks = iter(jax.random.split(key, 16))

    def nrm(shape, s=0.02, dtype=jnp.float32):
        return (s * jax.random.normal(next(ks), shape, jnp.float32)).astype(dtype)

    word_emb = nrm((V, H), dtype=jnp.bfloat16)          # bf16 MXU operand / emb stream
    pos_emb = nrm((S, H))
    encoder = dict(
        wqkv=nrm((3 * H, H), dtype=jnp.bfloat16), bqkv=jnp.zeros((1, 3 * H), jnp.float32),
        wo=nrm((H, H), dtype=jnp.bfloat16), bo=jnp.zeros((1, H), jnp.float32),
        g1=jnp.ones((1, H), jnp.float32), be1=jnp.zeros((1, H), jnp.float32),
        w1=nrm((FF, H), dtype=jnp.bfloat16), b1=jnp.zeros((1, FF), jnp.float32),
        w2=nrm((H, FF), dtype=jnp.bfloat16), b2=jnp.zeros((1, H), jnp.float32),
        g2=jnp.ones((1, H), jnp.float32), be2=jnp.zeros((1, H), jnp.float32),
    )
    proj_w = [nrm((H, H), dtype=jnp.bfloat16) for _ in range(NUM_LG * NUM_LG)]
    proj_b = [nrm((1, H), 0.01) for _ in range(NUM_LG * NUM_LG)]
    return dict(word_emb=word_emb, pos_emb=pos_emb, encoder=encoder,
                align_embedding=word_emb,   # clone of word embeddings, as in __init__
                proj_w=proj_w, proj_b=proj_b)


if __name__ == "__main__":
    root = jax.random.PRNGKey(0)
    kp, k_ids, k_lsrc, k_ltgt = jax.random.split(root, 4)
    params = init_params(kp)

    input_ids = jax.random.randint(k_ids, (B, S), 0, V, dtype=jnp.int32)
    attention_mask = jnp.array([[1] * S, [1] * (S - 2) + [0, 0]], dtype=jnp.int32)
    labels_src = jax.random.bernoulli(k_lsrc, 0.5, (B, V)).astype(jnp.float32)
    labels_tgt = jax.random.bernoulli(k_ltgt, 0.5, (B, V)).astype(jnp.float32)
    lg_in, lg_out = 0, 1

    fwd = jax.jit(cross_lingual_forward, static_argnums=(3, 4))
    loss, (logits_src, logits_tgt) = fwd(params, input_ids, attention_mask,
                                         lg_in, lg_out, labels_src, labels_tgt)
    jax.block_until_ready((loss, logits_src, logits_tgt))

    ref_loss, (ref_src, ref_tgt) = reference_forward(
        params, input_ids, attention_mask, lg_in, lg_out, labels_src, labels_tgt)

    assert logits_src.shape == (B, V) and logits_tgt.shape == (B, V)
    assert np.all(np.isfinite(np.asarray(loss)))
    np.testing.assert_allclose(np.asarray(logits_src), np.asarray(ref_src),
                               rtol=2e-2, atol=2e-3)
    np.testing.assert_allclose(np.asarray(logits_tgt), np.asarray(ref_tgt),
                               rtol=2e-2, atol=2e-3)
    np.testing.assert_allclose(np.asarray(loss), np.asarray(ref_loss),
                               rtol=2e-2, atol=2e-3)
    print("KERNEL_OK")
</pallas_src>

<mosaic_0001>
module attributes {stable_mosaic.version = 11 : i64} {
  func.func @encoder_kernel(%arg0: memref<2x8x128xf32, #tpu.memory_space<vmem>>, %arg1: memref<2x1x8xf32, #tpu.memory_space<vmem>>, %arg2: memref<384x128xbf16, #tpu.memory_space<vmem>>, %arg3: memref<1x384xf32, #tpu.memory_space<vmem>>, %arg4: memref<128x128xbf16, #tpu.memory_space<vmem>>, %arg5: memref<1x128xf32, #tpu.memory_space<vmem>>, %arg6: memref<1x128xf32, #tpu.memory_space<vmem>>, %arg7: memref<1x128xf32, #tpu.memory_space<vmem>>, %arg8: memref<512x128xbf16, #tpu.memory_space<vmem>>, %arg9: memref<1x512xf32, #tpu.memory_space<vmem>>, %arg10: memref<128x512xbf16, #tpu.memory_space<vmem>>, %arg11: memref<1x128xf32, #tpu.memory_space<vmem>>, %arg12: memref<1x128xf32, #tpu.memory_space<vmem>>, %arg13: memref<1x128xf32, #tpu.memory_space<vmem>>, %arg14: memref<2x8x128xf32, #tpu.memory_space<vmem>>) attributes {dimension_semantics = [], scalar_prefetch = 0 : i64, scratch_operands = 0 : i64, tpu.core_type = #tpu.core_type<tc>} {
    %c0 = arith.constant 0 : index
    %c0_0 = arith.constant 0 : index
    %0 = vector.load %arg2[%c0, %c0_0] : memref<384x128xbf16, #tpu.memory_space<vmem>>, vector<384x128xbf16>
    %c0_1 = arith.constant 0 : index
    %c0_2 = arith.constant 0 : index
    %1 = vector.load %arg3[%c0_1, %c0_2] : memref<1x384xf32, #tpu.memory_space<vmem>>, vector<1x384xf32>
    %c0_3 = arith.constant 0 : index
    %c0_4 = arith.constant 0 : index
    %2 = vector.load %arg4[%c0_3, %c0_4] : memref<128x128xbf16, #tpu.memory_space<vmem>>, vector<128x128xbf16>
    %c0_5 = arith.constant 0 : index
    %c0_6 = arith.constant 0 : index
    %3 = vector.load %arg5[%c0_5, %c0_6] : memref<1x128xf32, #tpu.memory_space<vmem>>, vector<1x128xf32>
    %c0_7 = arith.constant 0 : index
    %c0_8 = arith.constant 0 : index
    %4 = vector.load %arg6[%c0_7, %c0_8] : memref<1x128xf32, #tpu.memory_space<vmem>>, vector<1x128xf32>
    %c0_9 = arith.constant 0 : index
    %c0_10 = arith.constant 0 : index
    %5 = vector.load %arg7[%c0_9, %c0_10] : memref<1x128xf32, #tpu.memory_space<vmem>>, vector<1x128xf32>
    %c0_11 = arith.constant 0 : index
    %c0_12 = arith.constant 0 : index
    %6 = vector.load %arg8[%c0_11, %c0_12] : memref<512x128xbf16, #tpu.memory_space<vmem>>, vector<512x128xbf16>
    %c0_13 = arith.constant 0 : index
    %c0_14 = arith.constant 0 : index
    %7 = vector.load %arg9[%c0_13, %c0_14] : memref<1x512xf32, #tpu.memory_space<vmem>>, vector<1x512xf32>
    %c0_15 = arith.constant 0 : index
    %c0_16 = arith.constant 0 : index
    %8 = vector.load %arg10[%c0_15, %c0_16] : memref<128x512xbf16, #tpu.memory_space<vmem>>, vector<128x512xbf16>
    %c0_17 = arith.constant 0 : index
    %c0_18 = arith.constant 0 : index
    %9 = vector.load %arg11[%c0_17, %c0_18] : memref<1x128xf32, #tpu.memory_space<vmem>>, vector<1x128xf32>
    %c0_19 = arith.constant 0 : index
    %c0_20 = arith.constant 0 : index
    %10 = vector.load %arg12[%c0_19, %c0_20] : memref<1x128xf32, #tpu.memory_space<vmem>>, vector<1x128xf32>
    %c0_21 = arith.constant 0 : index
    %c0_22 = arith.constant 0 : index
    %11 = vector.load %arg13[%c0_21, %c0_22] : memref<1x128xf32, #tpu.memory_space<vmem>>, vector<1x128xf32>
    %c0_23 = arith.constant 0 : index
    %c0_24 = arith.constant 0 : index
    %c0_25 = arith.constant 0 : index
    %12 = vector.load %arg0[%c0_23, %c0_24, %c0_25] : memref<2x8x128xf32, #tpu.memory_space<vmem>>, vector<2x8x128xf32>
    %c0_26 = arith.constant 0 : index
    %c0_27 = arith.constant 0 : index
    %c0_28 = arith.constant 0 : index
    %13 = vector.load %arg1[%c0_26, %c0_27, %c0_28] : memref<2x1x8xf32, #tpu.memory_space<vmem>>, vector<2x1x8xf32>
    %14 = vector.shape_cast %12 : vector<2x8x128xf32> to vector<16x128xf32>
    %15 = arith.truncf %14 : vector<16x128xf32> to vector<16x128xbf16>
    %cst = arith.constant dense<0.000000e+00> : vector<16x384xf32>
    %16 = tpu.matmul %15, %0, %cst {dimension_numbers = #tpu.dot_dimension_numbers<[1], [1], [0], [0], [0, 0, 1, 0], [], []>} : vector<16x128xbf16>, vector<384x128xbf16>, vector<16x384xf32> -> vector<16x384xf32>
    %17 = vector.broadcast %1 : vector<1x384xf32> to vector<16x384xf32>
    %18 = arith.addf %16, %17 : vector<16x384xf32>
    %19 = vector.extract_strided_slice %18 {offsets = [0, 0], sizes = [16, 128], strides = [1, 1]} : vector<16x384xf32> to vector<16x128xf32>
    %20 = vector.shape_cast %19 : vector<16x128xf32> to vector<2x8x128xf32>
    %21 = vector.extract_strided_slice %18 {offsets = [0, 128], sizes = [16, 128], strides = [1, 1]} : vector<16x384xf32> to vector<16x128xf32>
    %22 = vector.shape_cast %21 : vector<16x128xf32> to vector<2x8x128xf32>
    %23 = vector.extract_strided_slice %18 {offsets = [0, 256], sizes = [16, 128], strides = [1, 1]} : vector<16x384xf32> to vector<16x128xf32>
    %24 = vector.shape_cast %23 : vector<16x128xf32> to vector<2x8x128xf32>
    %25 = arith.truncf %20 : vector<2x8x128xf32> to vector<2x8x128xbf16>
    %26 = arith.truncf %22 : vector<2x8x128xf32> to vector<2x8x128xbf16>
    "tpu.trace_start"() <{level = 10 : i32, message = "bqh,bkh->bqk"}> : () -> ()
    %cst_29 = arith.constant dense<0.000000e+00> : vector<2x8x8xf32>
    %27 = tpu.matmul %25, %26, %cst_29 {dimension_numbers = #tpu.dot_dimension_numbers<[2], [2], [1], [1], [0, 0, 0, 1, 1, 1], [0], [0]>} : vector<2x8x128xbf16>, vector<2x8x128xbf16>, vector<2x8x8xf32> -> vector<2x8x8xf32>
    "tpu.trace_stop"() : () -> ()
    %cst_30 = arith.constant 0.0883883461 : f32
    %28 = vector.broadcast %cst_30 : f32 to vector<2x8x8xf32>
    %29 = arith.mulf %27, %28 : vector<2x8x8xf32>
    %30 = vector.broadcast %13 : vector<2x1x8xf32> to vector<2x8x8xf32>
    %31 = arith.addf %29, %30 : vector<2x8x8xf32>
    %cst_31 = arith.constant dense<0xFF800000> : vector<2x8xf32>
    %32 = vector.multi_reduction <maximumf>, %31, %cst_31 [2] : vector<2x8x8xf32> to vector<2x8xf32>
    %33 = vector.shape_cast %32 : vector<2x8xf32> to vector<2x8x1xf32>
    %34 = vector.broadcast %33 : vector<2x8x1xf32> to vector<2x8x8xf32>
    %35 = arith.subf %31, %34 : vector<2x8x8xf32>
    %36 = math.exp %35 : vector<2x8x8xf32>
    %cst_32 = arith.constant dense<0.000000e+00> : vector<2x8xf32>
    %37 = vector.multi_reduction <add>, %36, %cst_32 [2] : vector<2x8x8xf32> to vector<2x8xf32>
    %38 = vector.shape_cast %37 : vector<2x8xf32> to vector<2x8x1xf32>
    %39 = tpu.reciprocal %38 {approx = true} : vector<2x8x1xf32> -> vector<2x8x1xf32>
    %40 = vector.broadcast %39 : vector<2x8x1xf32> to vector<2x8x8xf32>
    %41 = arith.mulf %36, %40 : vector<2x8x8xf32>
    %42 = arith.truncf %41 : vector<2x8x8xf32> to vector<2x8x8xbf16>
    %43 = arith.truncf %24 : vector<2x8x128xf32> to vector<2x8x128xbf16>
    "tpu.trace_start"() <{level = 10 : i32, message = "bqk,bkh->bqh"}> : () -> ()
    %cst_33 = arith.constant dense<0.000000e+00> : vector<2x8x128xf32>
    %44 = tpu.matmul %42, %43, %cst_33 {dimension_numbers = #tpu.dot_dimension_numbers<[2], [1], [1], [2], [0, 0, 0, 1, 1, 2], [0], [0]>} : vector<2x8x8xbf16>, vector<2x8x128xbf16>, vector<2x8x128xf32> -> vector<2x8x128xf32>
    "tpu.trace_stop"() : () -> ()
    %45 = vector.shape_cast %44 : vector<2x8x128xf32> to vector<16x128xf32>
    %46 = arith.truncf %45 : vector<16x128xf32> to vector<16x128xbf16>
    %cst_34 = arith.constant dense<0.000000e+00> : vector<16x128xf32>
    %47 = tpu.matmul %46, %2, %cst_34 {dimension_numbers = #tpu.dot_dimension_numbers<[1], [1], [0], [0], [0, 0, 1, 0], [], []>} : vector<16x128xbf16>, vector<128x128xbf16>, vector<16x128xf32> -> vector<16x128xf32>
    %48 = vector.broadcast %3 : vector<1x128xf32> to vector<16x128xf32>
    %49 = arith.addf %47, %48 : vector<16x128xf32>
    %50 = vector.shape_cast %49 : vector<16x128xf32> to vector<2x8x128xf32>
    %51 = arith.addf %12, %50 : vector<2x8x128xf32>
    %cst_35 = arith.constant dense<0.000000e+00> : vector<2x8xf32>
    %52 = vector.multi_reduction <add>, %51, %cst_35 [2] : vector<2x8x128xf32> to vector<2x8xf32>
    %53 = vector.shape_cast %52 : vector<2x8xf32> to vector<2x8x1xf32>
    %cst_36 = arith.constant 1.280000e+02 : f32
    %54 = vector.broadcast %cst_36 : f32 to vector<2x8x1xf32>
    %55 = arith.divf %53, %54 : vector<2x8x1xf32>
    %56 = vector.broadcast %55 : vector<2x8x1xf32> to vector<2x8x128xf32>
    %57 = arith.subf %51, %56 : vector<2x8x128xf32>
    %58 = arith.mulf %57, %57 : vector<2x8x128xf32>
    %cst_37 = arith.constant dense<0.000000e+00> : vector<2x8xf32>
    %59 = vector.multi_reduction <add>, %58, %cst_37 [2] : vector<2x8x128xf32> to vector<2x8xf32>
    %60 = vector.shape_cast %59 : vector<2x8xf32> to vector<2x8x1xf32>
    %cst_38 = arith.constant 1.280000e+02 : f32
    %61 = vector.broadcast %cst_38 : f32 to vector<2x8x1xf32>
    %62 = arith.divf %60, %61 : vector<2x8x1xf32>
    %63 = vector.broadcast %55 : vector<2x8x1xf32> to vector<2x8x128xf32>
    %64 = arith.subf %51, %63 : vector<2x8x128xf32>
    %cst_39 = arith.constant 9.99999974E-6 : f32
    %65 = vector.broadcast %cst_39 : f32 to vector<2x8x1xf32>
    %66 = arith.addf %62, %65 : vector<2x8x1xf32>
    %67 = math.rsqrt %66 : vector<2x8x1xf32>
    %68 = vector.broadcast %67 : vector<2x8x1xf32> to vector<2x8x128xf32>
    %69 = arith.mulf %64, %68 : vector<2x8x128xf32>
    %70 = vector.shape_cast %4 : vector<1x128xf32> to vector<1x1x128xf32>
    %71 = vector.broadcast %70 : vector<1x1x128xf32> to vector<2x8x128xf32>
    %72 = arith.mulf %69, %71 : vector<2x8x128xf32>
    %73 = vector.shape_cast %5 : vector<1x128xf32> to vector<1x1x128xf32>
    %74 = vector.broadcast %73 : vector<1x1x128xf32> to vector<2x8x128xf32>
    %75 = arith.addf %72, %74 : vector<2x8x128xf32>
    %76 = vector.shape_cast %75 : vector<2x8x128xf32> to vector<16x128xf32>
    %77 = arith.truncf %76 : vector<16x128xf32> to vector<16x128xbf16>
    %cst_40 = arith.constant dense<0.000000e+00> : vector<16x512xf32>
    %78 = tpu.matmul %77, %6, %cst_40 {dimension_numbers = #tpu.dot_dimension_numbers<[1], [1], [0], [0], [0, 0, 1, 0], [], []>} : vector<16x128xbf16>, vector<512x128xbf16>, vector<16x512xf32> -> vector<16x512xf32>
    %79 = vector.broadcast %7 : vector<1x512xf32> to vector<16x512xf32>
    %80 = arith.addf %78, %79 : vector<16x512xf32>
    %81 = arith.mulf %80, %80 : vector<16x512xf32>
    %82 = arith.mulf %80, %81 : vector<16x512xf32>
    %cst_41 = arith.constant 4.471500e-02 : f32
    %83 = vector.broadcast %cst_41 : f32 to vector<16x512xf32>
    %84 = arith.mulf %83, %82 : vector<16x512xf32>
    %85 = arith.addf %80, %84 : vector<16x512xf32>
    %cst_42 = arith.constant 0.797884583 : f32
    %86 = vector.broadcast %cst_42 : f32 to vector<16x512xf32>
    %87 = arith.mulf %86, %85 : vector<16x512xf32>
    %88 = math.tanh %87 : vector<16x512xf32>
    %cst_43 = arith.constant 1.000000e+00 : f32
    %89 = vector.broadcast %cst_43 : f32 to vector<16x512xf32>
    %90 = arith.addf %89, %88 : vector<16x512xf32>
    %cst_44 = arith.constant 5.000000e-01 : f32
    %91 = vector.broadcast %cst_44 : f32 to vector<16x512xf32>
    %92 = arith.mulf %91, %90 : vector<16x512xf32>
    %93 = arith.mulf %80, %92 : vector<16x512xf32>
    %94 = arith.truncf %93 : vector<16x512xf32> to vector<16x512xbf16>
    %cst_45 = arith.constant dense<0.000000e+00> : vector<16x128xf32>
    %95 = tpu.matmul %94, %8, %cst_45 {dimension_numbers = #tpu.dot_dimension_numbers<[1], [1], [0], [0], [0, 0, 1, 0], [], []>} : vector<16x512xbf16>, vector<128x512xbf16>, vector<16x128xf32> -> vector<16x128xf32>
    %96 = vector.broadcast %9 : vector<1x128xf32> to vector<16x128xf32>
    %97 = arith.addf %95, %96 : vector<16x128xf32>
    %98 = vector.shape_cast %97 : vector<16x128xf32> to vector<2x8x128xf32>
    %99 = arith.addf %75, %98 : vector<2x8x128xf32>
    %cst_46 = arith.constant dense<0.000000e+00> : vector<2x8xf32>
    %100 = vector.multi_reduction <add>, %99, %cst_46 [2] : vector<2x8x128xf32> to vector<2x8xf32>
    %101 = vector.shape_cast %100 : vector<2x8xf32> to vector<2x8x1xf32>
    %cst_47 = arith.constant 1.280000e+02 : f32
    %102 = vector.broadcast %cst_47 : f32 to vector<2x8x1xf32>
    %103 = arith.divf %101, %102 : vector<2x8x1xf32>
    %104 = vector.broadcast %103 : vector<2x8x1xf32> to vector<2x8x128xf32>
    %105 = arith.subf %99, %104 : vector<2x8x128xf32>
    %106 = arith.mulf %105, %105 : vector<2x8x128xf32>
    %cst_48 = arith.constant dense<0.000000e+00> : vector<2x8xf32>
    %107 = vector.multi_reduction <add>, %106, %cst_48 [2] : vector<2x8x128xf32> to vector<2x8xf32>
    %108 = vector.shape_cast %107 : vector<2x8xf32> to vector<2x8x1xf32>
    %cst_49 = arith.constant 1.280000e+02 : f32
    %109 = vector.broadcast %cst_49 : f32 to vector<2x8x1xf32>
    %110 = arith.divf %108, %109 : vector<2x8x1xf32>
    %111 = vector.broadcast %103 : vector<2x8x1xf32> to vector<2x8x128xf32>
    %112 = arith.subf %99, %111 : vector<2x8x128xf32>
    %cst_50 = arith.constant 9.99999974E-6 : f32
    %113 = vector.broadcast %cst_50 : f32 to vector<2x8x1xf32>
    %114 = arith.addf %110, %113 : vector<2x8x1xf32>
    %115 = math.rsqrt %114 : vector<2x8x1xf32>
    %116 = vector.broadcast %115 : vector<2x8x1xf32> to vector<2x8x128xf32>
    %117 = arith.mulf %112, %116 : vector<2x8x128xf32>
    %118 = vector.shape_cast %10 : vector<1x128xf32> to vector<1x1x128xf32>
    %119 = vector.broadcast %118 : vector<1x1x128xf32> to vector<2x8x128xf32>
    %120 = arith.mulf %117, %119 : vector<2x8x128xf32>
    %121 = vector.shape_cast %11 : vector<1x128xf32> to vector<1x1x128xf32>
    %122 = vector.broadcast %121 : vector<1x1x128xf32> to vector<2x8x128xf32>
    %123 = arith.addf %120, %122 : vector<2x8x128xf32>
    %c0_51 = arith.constant 0 : index
    %c0_52 = arith.constant 0 : index
    %c0_53 = arith.constant 0 : index
    %124 = vector.load %arg14[%c0_51, %c0_52, %c0_53] : memref<2x8x128xf32, #tpu.memory_space<vmem>>, vector<2x8x128xf32>
    tpu.vector_store %arg14[%c0_51, %c0_52, %c0_53], %123 {strides = array<i32>} : memref<2x8x128xf32, #tpu.memory_space<vmem>>, vector<2x8x128xf32>,
    return
  }
}

module attributes {stable_mosaic.version = 11 : i64} {
  func.func @head_kernel(%arg0: i32, %arg1: memref<2x8x128xf32, #tpu.memory_space<vmem>>, %arg2: memref<256x128xbf16, #tpu.memory_space<vmem>>, %arg3: memref<1x256xf32, #tpu.memory_space<vmem>>, %arg4: memref<128x128xbf16, #tpu.memory_space<vmem>>, %arg5: memref<2x2x128xf32, #tpu.memory_space<vmem>>) attributes {dimension_semantics = [#tpu.dimension_semantics<parallel>], iteration_bounds = array<i64: 4>, scalar_prefetch = 0 : i64, scratch_operands = 0 : i64, tpu.core_type = #tpu.core_type<tc>, window_params = [{pipeline_mode = #tpu.pipeline_mode<synchronous>, transform_indices = @transform_0, window_bounds = array<i64: 2, 8, 128>}, {pipeline_mode = #tpu.pipeline_mode<synchronous>, transform_indices = @transform_1, window_bounds = array<i64: 256, 128>}, {pipeline_mode = #tpu.pipeline_mode<synchronous>, transform_indices = @transform_2, window_bounds = array<i64: 1, 256>}, {transform_indices = @transform_3, window_bounds = array<i64: 128, 128>}, {transform_indices = @transform_4, window_bounds = array<i64: 2, 2, 128>}]} {
    %c0 = arith.constant 0 : index
    %c0_0 = arith.constant 0 : index
    %c0_1 = arith.constant 0 : index
    %0 = vector.load %arg1[%c0, %c0_0, %c0_1] : memref<2x8x128xf32, #tpu.memory_space<vmem>>, vector<2x8x128xf32>
    %c0_2 = arith.constant 0 : index
    %c0_3 = arith.constant 0 : index
    %1 = vector.load %arg2[%c0_2, %c0_3] : memref<256x128xbf16, #tpu.memory_space<vmem>>, vector<256x128xbf16>
    %c0_4 = arith.constant 0 : index
    %c0_5 = arith.constant 0 : index
    %2 = vector.load %arg3[%c0_4, %c0_5] : memref<1x256xf32, #tpu.memory_space<vmem>>, vector<1x256xf32>
    %c0_6 = arith.constant 0 : index
    %c0_7 = arith.constant 0 : index
    %3 = vector.load %arg4[%c0_6, %c0_7] : memref<128x128xbf16, #tpu.memory_space<vmem>>, vector<128x128xbf16>
    %4 = vector.shape_cast %0 : vector<2x8x128xf32> to vector<16x128xf32>
    %5 = arith.truncf %4 : vector<16x128xf32> to vector<16x128xbf16>
    %cst = arith.constant dense<0.000000e+00> : vector<16x256xf32>
    %6 = tpu.matmul %5, %1, %cst {dimension_numbers = #tpu.dot_dimension_numbers<[1], [1], [0], [0], [0, 0, 1, 0], [], []>} : vector<16x128xbf16>, vector<256x128xbf16>, vector<16x256xf32> -> vector<16x256xf32>
    %7 = vector.broadcast %2 : vector<1x256xf32> to vector<16x256xf32>
    %8 = arith.addf %6, %7 : vector<16x256xf32>
    %9 = vector.extract_strided_slice %8 {offsets = [0, 0], sizes = [16, 128], strides = [1, 1]} : vector<16x256xf32> to vector<16x128xf32>
    %10 = vector.extract_strided_slice %8 {offsets = [0, 128], sizes = [16, 128], strides = [1, 1]} : vector<16x256xf32> to vector<16x128xf32>
    %11 = tpu.concatenate %9, %10 in 0 : vector<16x128xf32>, vector<16x128xf32> -> vector<32x128xf32>
    %12 = arith.truncf %11 : vector<32x128xf32> to vector<32x128xbf16>
    %cst_8 = arith.constant dense<0.000000e+00> : vector<32x128xf32>
    %13 = tpu.matmul %12, %3, %cst_8 {dimension_numbers = #tpu.dot_dimension_numbers<[1], [1], [0], [0], [0, 0, 1, 0], [], []>} : vector<32x128xbf16>, vector<128x128xbf16>, vector<32x128xf32> -> vector<32x128xf32>
    %14 = vector.shape_cast %13 : vector<32x128xf32> to vector<2x2x8x128xf32>
    %cst_9 = arith.constant dense<0xFF800000> : vector<2x2x128xf32>
    %15 = vector.multi_reduction <maximumf>, %14, %cst_9 [2] : vector<2x2x8x128xf32> to vector<2x2x128xf32>
    %16 = vector.shape_cast %15 : vector<2x2x128xf32> to vector<2x2x1x128xf32>
    %17 = vector.broadcast %16 : vector<2x2x1x128xf32> to vector<2x2x8x128xf32>
    %18 = arith.subf %14, %17 : vector<2x2x8x128xf32>
    %19 = math.exp %18 : vector<2x2x8x128xf32>
    %cst_10 = arith.constant dense<0.000000e+00> : vector<2x2x128xf32>
    %20 = vector.multi_reduction <add>, %19, %cst_10 [2] : vector<2x2x8x128xf32> to vector<2x2x128xf32>
    %21 = vector.shape_cast %20 : vector<2x2x128xf32> to vector<2x2x1x128xf32>
    %22 = tpu.reciprocal %21 {approx = true} : vector<2x2x1x128xf32> -> vector<2x2x1x128xf32>
    %23 = vector.broadcast %22 : vector<2x2x1x128xf32> to vector<2x2x8x128xf32>
    %24 = arith.mulf %19, %23 : vector<2x2x8x128xf32>
    %25 = arith.mulf %14, %24 : vector<2x2x8x128xf32>
    %cst_11 = arith.constant dense<0.000000e+00> : vector<2x2x128xf32>
    %26 = vector.multi_reduction <add>, %25, %cst_11 [2] : vector<2x2x8x128xf32> to vector<2x2x128xf32>
    %c0_12 = arith.constant 0 : index
    %c0_13 = arith.constant 0 : index
    %c0_14 = arith.constant 0 : index
    %27 = vector.load %arg5[%c0_12, %c0_13, %c0_14] : memref<2x2x128xf32, #tpu.memory_space<vmem>>, vector<2x2x128xf32>
    tpu.vector_store %arg5[%c0_12, %c0_13, %c0_14], %26 {strides = array<i32>} : memref<2x2x128xf32, #tpu.memory_space<vmem>>, vector<2x2x128xf32>,
    return
  }
  func.func @transform_0(%arg0: i32) -> (i32, i32, i32) {
    %c0_i32 = arith.constant 0 : i32
    %c0_i32_0 = arith.constant 0 : i32
    %c0_i32_1 = arith.constant 0 : i32
    %c0_i32_2 = arith.constant 0 : i32
    return %c0_i32, %c0_i32_0, %c0_i32_1 : i32, i32, i32
  }
  func.func @transform_1(%arg0: i32) -> (i32, i32) {
    %c0_i32 = arith.constant 0 : i32
    %c0_i32_0 = arith.constant 0 : i32
    %c0_i32_1 = arith.constant 0 : i32
    return %c0_i32, %c0_i32_0 : i32, i32
  }
  func.func @transform_2(%arg0: i32) -> (i32, i32) {
    %c0_i32 = arith.constant 0 : i32
    %c0_i32_0 = arith.constant 0 : i32
    %c0_i32_1 = arith.constant 0 : i32
    return %c0_i32, %c0_i32_0 : i32, i32
  }
  func.func @transform_3(%arg0: i32) -> (i32, i32) {
    %c0_i32 = arith.constant 0 : i32
    %c0_i32_0 = arith.constant 0 : i32
    return %arg0, %c0_i32 : i32, i32
  }
  func.func @transform_4(%arg0: i32) -> (i32, i32, i32) {
    %c0_i32 = arith.constant 0 : i32
    %c0_i32_0 = arith.constant 0 : i32
    %c0_i32_1 = arith.constant 0 : i32
    return %c0_i32, %c0_i32_0, %arg0 : i32, i32, i32
  }
}

</mosaic_0001>

<bundles_post_ra>
// kernel: cross_lingual_forward.3
= control target key start
LH: loop header
LB: loop body
LE: loop exit
PB: predicated region body
PF: predicated region fallthrough
CT: control target
= control target key end

     0   :  { %9 = vsyncpa [#allocation3], 0  ;;  %s1166_s0 = inlined_call_operand.vmem [shape: f32[2,8,128], index: 0, kind: input, shape index: {}]   ;;  %s1167_s1 = inlined_call_operand.vmem [shape: bf16[256,128], index: 1, kind: input, shape index: {}]   ;;  %s1168_s2 = inlined_call_operand.vmem [shape: f32[1,256], index: 2, kind: input, shape index: {}]   ;;  %s1169_s3 = inlined_call_operand.hbm [shape: bf16[512,128], index: 3, kind: input, shape index: {}]   ;;  %s1170_s4 = inlined_call_operand.vmem [shape: f32[2,2,512], index: 4, kind: output, shape index: {}]  }
   0x1   :  { %11 = vsyncpa [#allocation3 + $0x1], 0  ;;  %s972_s15 = smov 0   ;;  %s974_s16 = smov 0  }
   0x2   :  { %s976_s17 = smov 0   ;;  %s978_s18 = smov 0  }
   0x3 LB: > { %s991_s19 = sadd.s32 4294967295, %s943_s18   ;;  %s994_s20 = sadd.s32 1, %s943_s18   ;;  %s943_s18 = sphi %s978_s18, %s1178_s18   ;;  %s939_s17 = sphi %s976_s17, %s1177_s17   ;;  %s935_s16 = sphi %s974_s16, %s1176_s16   ;;  %s931_s15 = sphi %s972_s15, %s1175_s15  }
   0x4   : > { %s84_s21 = ssub.s32 %s943_s18, %s994_s20  ;;  %s87_s22 = sadd.s32 1, %s939_s17 }
   0x5   : > { %p85_p0 = scmp.eq.s32.totalorder %s84_s21, 0  ;;  %p94_p1 = scmp.ne.s32.totalorder %s939_s17, %s935_s16 }
   0x6   : > { %p95_p2 = scmp.eq.s32.totalorder %s943_s18, 0  ;;  %p100_p3 = scmp.ne.s32.totalorder %s935_s16, %s931_s15 }
   0x7   : > { %s1004_s23 = scalar_select %p85_p0, %s939_s17, %s87_s22  }
   0x8   : > { %p1006_p4 = por %p95_p2, %p94_p1  ;;  %p101_p5 = scmp.eq.s32.totalorder %s991_s19, 0 }
   0x9   : > { %p124_p6 = scmp.eq.s32.totalorder %s991_s19, 3  ;;  %p828_p8 = scmp.lt.s32.totalorder %s943_s18, 4 }
   0xa   : > { %p1012_p7 = por %p101_p5, %p100_p3  ;;  %s159_s27 = sand.u32 1, %s939_s17  }
   0xb   : > { %p1017_p9 = por %p124_p6, %p94_p1  ;;  %s683_s28 = sshll.u32 %s159_s27, 6 }
   0xc   : > { %s789_s29 = sshll.u32 %s943_s18, 6  ;;  %s163_s7 = scalar_lea.vmem [#allocation2], %s683_s28 }
   0xd   : > { %s168_s6 = scalar_lea.hbm %s1169_s3, %s789_s29  ;;  %s171_s8 = sshll.u32 %s163_s7, 4  ;;  %s172_s8 = int_to_ptr.vmem [resolvable:$true] %s171_s8 }
   0xe   : > { %s169_s9 = sshll.u32 %s168_s6, 4  ;;  %p1028_p10 = pnand %p828_p8, %p1006_p4  ;;  %s170_s9 = int_to_ptr.hbm [resolvable:$true] %s169_s9 }
   0xf   : > { %p686_p11 = scmp.ge.s32.totalorder %s943_s18, 1  ;;  %s160_s11 = scalar_lea.sflag [#allocation3], %s159_s27 }
  0x10   : > { %s879_s12 = sshra.s32 %s170_s9, 4  ;;  %p883_p13 = pneg %p1028_p10  ;;  %s880_s12 = int_to_ptr.hbm [resolvable:$true] %s879_s12 }
  0x11   : > { %s881_s13 = scalar_lea.hbm %s880_s12, 64  ;;  %s886_s21 = scalar_lea.hbm %s1169_s3, 256 }
  0x12   : > { %p882_p12 = scmp.ne.s32.totalorder %s880_s12, %s881_s13  ;;  %p887_p2 = scmp.lt.s32.totalorder %s880_s12, %s1169_s3 }
  0x13   : > { %p888_p3 = scmp.lt.s32.totalorder %s886_s21, %s881_s13 }
  0x14   : > { %p884_p0 = pnand %p883_p13, %p882_p12 }
  0x15   : > { %p889_p4 = por %p888_p3, %p887_p2 }
  0x16   : > { %p885_p1 = pneg %p884_p0 }
  0x18   : > { %p890_p5 = pnand %p889_p4, %p885_p1 }
  0x1a   : > { %893 = shalt.err (!%p890_p5)
}
  0x1b   : > { %s945_s27 = smov 64   ;;  %s946_s28 = smov 4  }
  0x1c   : > { %827 = dma.hbm_to_vmem [thread:$0]  (!%p1028_p10), %s170_s9, 1024, %s172_s8, %s160_s11, %s945_s27, %s945_s27, %s946_s28  }
  0x1d   : > { %p179_p6 = scmp.lt.s32.totalorder %s943_s18, 5 }
  0x1f   : > { %p180_p8 = pnand %p686_p11, %p179_p6 }
  0x20   : > { %s1047_s29 = sand.u32 (!%p180_p8), 1, %s935_s16  }
  0x21   : > { %183 = sbr.rel (%p180_p8) target bundleno = 450 (0x1c2), region = 36  ;;  %s687_s30 = sshll.u32 (!%p180_p8), %s1047_s29, 6 }
  0x22   : > { %s186_s5 = scalar_lea.sflag (!%p180_p8), [#allocation3], %s1047_s29  ;;  %s1051_s6 = scalar_lea.vmem (!%p180_p8), [#allocation2], %s687_s30 }
  0x26   : > { %926 = dma.done.wait (%p1012_p7), %s186_s5, 1024  }
  0x27   : > { %928 = vsyncadd (%p1012_p7), %s186_s5, 4294966272  ;;  %v797_v0 = vld [vmem:[%s1167_s1 + $0x38] sm:$0xff]  ;;  %v796_v2 = vld [vmem:[%s1167_s1 + $0x30] sm:$0xff]  ;;  %vm565_vm0 = vcmask 1041409   ;;  %s786_s9 = sshll.u32 (%p1017_p9), %s991_s19, 1 }
  0x28   : > { %v805_v1 = vld [vmem:[%s1167_s1 + $0x78] sm:$0xff]  ;;  %368 = vmatpush.bf16.xpose.msra.mxu0 %v797_v0  ;;  %v804_v3 = vld [vmem:[%s1167_s1 + $0x70] sm:$0xff]  ;;  %v795_v4 = vld [vmem:[%s1167_s1 + $0x28] sm:$0xff]  ;;  %s580_s11 = scalar_lea.vmem (%p1017_p9), %s1170_s4, %s786_s9 }
  0x29   : > { %382 = vmatpush.bf16.xpose.msra.mxu1 %v805_v1  ;;  %v803_v5 = vld [vmem:[%s1167_s1 + $0x68] sm:$0xff]  ;;  %v794_v6 = vld [vmem:[%s1167_s1 + $0x20] sm:$0xff]  ;;  %v793_v8 = vld [vmem:[%s1167_s1 + $0x18] sm:$0xff] }
  0x2a   : > { %v802_v7 = vld [vmem:[%s1167_s1 + $0x60] sm:$0xff]  ;;  %v801_v9 = vld [vmem:[%s1167_s1 + $0x58] sm:$0xff]  ;;  %v792_v11 = vld [vmem:[%s1167_s1 + $0x10] sm:$0xff] }
  0x2b   : > { %v813_v10 = vld [vmem:[%s1051_s6 + $0x38] sm:$0xff]  ;;  %v800_v12 = vld [vmem:[%s1167_s1 + $0x50] sm:$0xff]  ;;  %v791_v14 = vld [vmem:[%s1167_s1 + $0x8] sm:$0xff] }
  0x2c   : > { %446 = vmatpush.bf16.xpose.msra.mxu2 %v813_v10  ;;  %814 = vmatpush.bf16.xpose.msra.mxu3 %v813_v10  ;;  %v812_v13 = vld [vmem:[%s1051_s6 + $0x30] sm:$0xff]  ;;  %v799_v15 = vld [vmem:[%s1167_s1 + $0x48] sm:$0xff]  ;;  %v790_v17 = vld [vmem:[%s1167_s1] sm:$0xff] }
  0x2d   : > { %v811_v16 = vld [vmem:[%s1051_s6 + $0x28] sm:$0xff]  ;;  %v798_v18 = vld [vmem:[%s1167_s1 + $0x40] sm:$0xff]  ;;  %v809_v23 = vld [vmem:[%s1051_s6 + $0x18] sm:$0xff] }
  0x2e   : > { %v810_v19 = vld [vmem:[%s1051_s6 + $0x20] sm:$0xff]  ;;  %v216_v21 = vld [vmem:[%s1166_s0 + $0x8] sm:$0xff]  ;;  %v808_v24 = vld [vmem:[%s1051_s6 + $0x10] sm:$0xff] }
  0x2f   : > { %v215_v20 = vld [vmem:[%s1166_s0] sm:$0xff]  ;;  %v807_v25 = vld [vmem:[%s1051_s6 + $0x8] sm:$0xff] }
  0x30   : > { %369 = vmatpush.bf16.xpose.msra.mxu0 %v796_v2  ;;  %v266_v22 = vpack.c.bf16 %v216_v21, %v215_v20  ;;  %v806_v26 = vld [vmem:[%s1051_s6] sm:$0xff]  ;;  %s688_s6 = sshll.u32 %s1047_s29, 2 }
  0x31   : > { %383 = vmatpush.bf16.xpose.msra.mxu1 %v804_v3  ;;  %v249_v29 = vld [vmem:[%s1168_s2] sm:$0x3]  ;;  %s213_s18 = scalar_lea.vmem [#allocation4], %s688_s6 }
  0x32   : > { %v268_v30 = vperm.slane %v249_v29, 0  ;;  %v269_v31 = vperm.slane %v249_v29, 1 }
  0x34   : > { %447 = vmatpush.bf16.xpose.msra.mxu2 %v812_v13  ;;  %815 = vmatpush.bf16.xpose.msra.mxu3 %v812_v13 }
  0x38   : > { %370 = vmatpush.bf16.xpose.msra.mxu0 %v795_v4 }
  0x39   : > { %384 = vmatpush.bf16.xpose.msra.mxu1 %v803_v5 }
  0x3c   : > { %448 = vmatpush.bf16.xpose.msra.mxu2 %v811_v16  ;;  %816 = vmatpush.bf16.xpose.msra.mxu3 %v811_v16 }
  0x40   : > { %371 = vmatpush.bf16.xpose.msra.mxu0 %v794_v6 }
  0x41   : > { %385 = vmatpush.bf16.xpose.msra.mxu1 %v802_v7 }
  0x44   : > { %449 = vmatpush.bf16.xpose.msra.mxu2 %v810_v19  ;;  %817 = vmatpush.bf16.xpose.msra.mxu3 %v810_v19 }
  0x48   : > { %372 = vmatpush.bf16.xpose.msra.mxu0 %v793_v8 }
  0x49   : > { %386 = vmatpush.bf16.xpose.msra.mxu1 %v801_v9 }
  0x4c   : > { %450 = vmatpush.bf16.xpose.msra.mxu2 %v809_v23  ;;  %818 = vmatpush.bf16.xpose.msra.mxu3 %v809_v23 }
  0x50   : > { %373 = vmatpush.bf16.xpose.msra.mxu0 %v792_v11 }
  0x51   : > { %387 = vmatpush.bf16.xpose.msra.mxu1 %v800_v12 }
  0x54   : > { %451 = vmatpush.bf16.xpose.msra.mxu2 %v808_v24  ;;  %819 = vmatpush.bf16.xpose.msra.mxu3 %v808_v24 }
  0x58   : > { %374 = vmatpush.bf16.xpose.msra.mxu0 %v791_v14 }
  0x59   : > { %388 = vmatpush.bf16.xpose.msra.mxu1 %v799_v15 }
  0x5c   : > { %452 = vmatpush.bf16.xpose.msra.mxu2 %v807_v25  ;;  %820 = vmatpush.bf16.xpose.msra.mxu3 %v807_v25 }
  0x60   : > { %375 = vmatpush.bf16.xpose.msra.mxu0 %v790_v17 }
  0x61   : > { %389 = vmatpush.bf16.xpose.msra.mxu1 %v798_v18 }
  0x64   : > { %453 = vmatpush.bf16.xpose.msra.mxu2 %v806_v26  ;;  %821 = vmatpush.bf16.xpose.msra.mxu3 %v806_v26 }
  0x67   : > { %376 = vmatmul.bf16.vlgmr.msra.gmra.mxu0 %v266_v22 }
  0x68   : > { %390 = vmatmul.bf16.vlgmr.msra.gmra.mxu1 %v266_v22 }
  0xe4   : > { %v377_v27 = vpop.f32.mrf.mxu0 }
  0xe5   : > { %v391_v28 = vpop.f32.mrf.mxu1  ;;  %v378_v34 = vadd.f32 %v377_v27, %v268_v30 }
  0xe6   : > { %v392_v35 = vadd.f32 %v391_v28, %v269_v31 }
  0xec   : > { %v379_v32 = vpop.f32.mrf.mxu0 }
  0xed   : > { %v393_v33 = vpop.f32.mrf.mxu1  ;;  %v380_v36 = vadd.f32 %v379_v32, %v268_v30 }
  0xee   : > { %v394_v37 = vadd.f32 %v393_v33, %v269_v31 }
  0xef   : > { %v396_v38 = vpack.c.bf16 %v380_v36, %v378_v34 }
  0xf0   : > { %v397_v39 = vpack.c.bf16 %v394_v37, %v392_v35 }
  0xf1   : > { %454 = vmatmul.bf16.vlgmr.msra.gmra.mxu2 %v396_v38 }
  0xf2   : > { %459 = vmatmul.bf16.vlgmr.msra.gmra.mxu3 %v397_v39 }
 0x174   : > { %v1122_v40 = vpop.f32.mrf.mxu2 }
 0x175   : > { %v1124_v41 = vpop.f32.mrf.mxu3  ;;  %v465_v42 = vrot.slane %v1122_v40, 4 }
 0x176   : > { %v477_v43 = vrot.slane %v1124_v41, 4 }
 0x177   : > { %v466_v44 = vmax.f32 %v1122_v40, %v465_v42 }
 0x178   : > { %v478_v45 = vmax.f32 %v1124_v41, %v477_v43 }
 0x179   : > { %v467_v46 = vrot.slane %v466_v44, 2 }
 0x17a   : > { %v479_v47 = vrot.slane %v478_v45, 2 }
 0x17b   : > { %v468_v48 = vmax.f32 %v466_v44, %v467_v46 }
 0x17c   : > { %v480_v49 = vmax.f32 %v478_v45, %v479_v47  ;;  %v1130_v50 = vpop.f32.mrf.mxu2 }
 0x17d   : > { %v1132_v51 = vpop.f32.mrf.mxu3  ;;  %v469_v52 = vrot.slane %v468_v48, 1  ;;  %v471_v54 = vrot.slane %v1130_v50, 4 }
 0x17e   : > { %v481_v53 = vrot.slane %v480_v49, 1  ;;  %v483_v55 = vrot.slane %v1132_v51, 4 }
 0x17f   : > { %v470_v56 = vmax.f32 %v468_v48, %v469_v52  ;;  %v472_v58 = vmax.f32 %v1130_v50, %v471_v54 }
 0x180   : > { %v482_v57 = vmax.f32 %v480_v49, %v481_v53  ;;  %v484_v59 = vmax.f32 %v1132_v51, %v483_v55 }
 0x181   : > { %v489_v60 = vsub.f32 %v1122_v40, %v470_v56  ;;  %v473_v62 = vrot.slane %v472_v58, 2 }
 0x182   : > { %v491_v61 = vsub.f32 %v1124_v41, %v482_v57  ;;  %v485_v63 = vrot.slane %v484_v59, 2 }
 0x183   : > { %v493_v0 = vmul.f32 1.442695, %v489_v60  ;;  %v474_v2 = vmax.f32 %v472_v58, %v473_v62 }
 0x184   : > { %v497_v1 = vmul.f32 1.442695, %v491_v61  ;;  %v486_v3 = vmax.f32 %v484_v59, %v485_v63 }
 0x185   : > { %863 = vpow2.f32 %v493_v0  ;;  %v475_v4 = vrot.slane %v474_v2, 1 }
 0x186   : > { %v487_v5 = vrot.slane %v486_v3, 1  ;;  %865 = vpow2.f32 %v497_v1 }
 0x187   : > { %v476_v6 = vmax.f32 %v474_v2, %v475_v4 }
 0x188   : > { %v488_v7 = vmax.f32 %v486_v3, %v487_v5 }
 0x189   : > { %v490_v8 = vsub.f32 %v1130_v50, %v476_v6 }
 0x18a   : > { %v492_v9 = vsub.f32 %v1132_v51, %v488_v7 }
 0x18b   : > { %v864_v10 = vpop.eup %863  ;;  %v495_v11 = vmul.f32 1.442695, %v490_v8 }
 0x18c   : > { %v499_v12 = vmul.f32 1.442695, %v492_v9  ;;  %v866_v13 = vpop.eup %865  ;;  %v501_v14 = vrot.slane %v864_v10, 4 }
 0x18d   : > { %v513_v15 = vrot.slane %v866_v13, 4  ;;  %867 = vpow2.f32 %v495_v11 }
 0x18e   : > { %v502_v16 = vadd.f32 %v864_v10, %v501_v14  ;;  %869 = vpow2.f32 %v499_v12 }
 0x18f   : > { %v514_v17 = vadd.f32 %v866_v13, %v513_v15 }
 0x190   : > { %v503_v18 = vrot.slane %v502_v16, 2 }
 0x191   : > { %v515_v19 = vrot.slane %v514_v17, 2 }
 0x192   : > { %v504_v20 = vadd.f32 %v503_v18, %v502_v16 }
 0x193   : > { %v868_v21 = vpop.eup %867  ;;  %v516_v22 = vadd.f32 %v515_v19, %v514_v17 }
 0x194   : > { %v870_v23 = vpop.eup %869  ;;  %v505_v24 = vrot.slane %v504_v20, 1  ;;  %v507_v25 = vrot.slane %v868_v21, 4 }
 0x195   : > { %v517_v26 = vrot.slane %v516_v22, 1  ;;  %v519_v27 = vrot.slane %v870_v23, 4 }
 0x196   : > { %v506_v28 = vadd.f32 %v505_v24, %v504_v20  ;;  %v508_v29 = vadd.f32 %v868_v21, %v507_v25 }
 0x197   : > { %v518_v30 = vadd.f32 %v517_v26, %v516_v22  ;;  %v520_v31 = vadd.f32 %v870_v23, %v519_v27 }
 0x198   : > { %871 = vrcp.f32 %v506_v28  ;;  %v509_v32 = vrot.slane %v508_v29, 2 }
 0x199   : > { %873 = vrcp.f32 %v518_v30  ;;  %v521_v33 = vrot.slane %v520_v31, 2 }
 0x19a   : > { %v510_v34 = vadd.f32 %v509_v32, %v508_v29 }
 0x19b   : > { %v522_v35 = vadd.f32 %v521_v33, %v520_v31 }
 0x19c   : > { %v511_v36 = vrot.slane %v510_v34, 1 }
 0x19d   : > { %v523_v37 = vrot.slane %v522_v35, 1 }
 0x19e   : > { %v872_v38 = vpop.eup %871  ;;  %v512_v39 = vadd.f32 %v511_v36, %v510_v34 }
 0x19f   : > { %v874_v42 = vpop.eup %873  ;;  %v529_v43 = vmul.f32 %v872_v38, %v864_v10  ;;  %v524_v44 = vadd.f32 %v523_v37, %v522_v35 }
 0x1a0   : > { %v531_v45 = vmul.f32 %v874_v42, %v866_v13  ;;  %875 = vrcp.f32 %v512_v39 }
 0x1a1   : > { %v533_v46 = vmul.f32 %v529_v43, %v1122_v40  ;;  %877 = vrcp.f32 %v524_v44 }
 0x1a2   : > { %v535_v47 = vmul.f32 %v531_v45, %v1124_v41 }
 0x1a3   : > { %v537_v48 = vrot.slane %v533_v46, 4 }
 0x1a4   : > { %v549_v49 = vrot.slane %v535_v47, 4 }
 0x1a5   : > { %v538_v52 = vadd.f32 %v537_v48, %v533_v46 }
 0x1a6   : > { %v876_v53 = vpop.eup %875  ;;  %v550_v54 = vadd.f32 %v549_v49, %v535_v47 }
 0x1a7   : > { %v878_v55 = vpop.eup %877  ;;  %v530_v56 = vmul.f32 %v876_v53, %v868_v21  ;;  %v539_v58 = vrot.slane %v538_v52, 2 }
 0x1a8   : > { %v532_v57 = vmul.f32 %v878_v55, %v870_v23  ;;  %v551_v60 = vrot.slane %v550_v54, 2 }
 0x1a9   : > { %v534_v59 = vmul.f32 %v530_v56, %v1130_v50  ;;  %v540_v63 = vadd.f32 %v539_v58, %v538_v52 }
 0x1aa   : > { %v536_v61 = vmul.f32 %v532_v57, %v1132_v51  ;;  %v552_v41 = vadd.f32 %v551_v60, %v550_v54 }
 0x1ab   : > { %v543_v62 = vrot.slane %v534_v59, 4  ;;  %v541_v4 = vrot.slane %v540_v63, 1 }
 0x1ac   : > { %v555_v40 = vrot.slane %v536_v61, 4  ;;  %v553_v6 = vrot.slane %v552_v41, 1 }
 0x1ad   : > { %v544_v0 = vadd.f32 %v543_v62, %v534_v59  ;;  %v542_v50 = vadd.f32 %v541_v4, %v540_v63 }
 0x1ae   : > { %v556_v1 = vadd.f32 %v555_v40, %v536_v61  ;;  %v554_v11 = vadd.f32 %v553_v6, %v552_v41 }
 0x1af   : > { %v545_v2 = vrot.slane %v544_v0, 2 }
 0x1b0   : > { %v557_v3 = vrot.slane %v556_v1, 2 }
 0x1b1   : > { %v546_v5 = vadd.f32 %v545_v2, %v544_v0 }
 0x1b2   : > { %v558_v7 = vadd.f32 %v557_v3, %v556_v1 }
 0x1b3   : > { %v547_v8 = vrot.slane %v546_v5, 1 }
 0x1b4   : > { %v559_v9 = vrot.slane %v558_v7, 1 }
 0x1b5   : > { %v548_v10 = vadd.f32 %v547_v8, %v546_v5  ;;  %578 = sbr.rel (!%p1017_p9) target bundleno = 450 (0x1c2), region = 44 }
 0x1b6   : > { %v560_v51 = vadd.f32 %v559_v9, %v558_v7 }
 0x1b7   : > { %v566_v12 = vsel %vm565_vm0, %v548_v10, %v542_v50 }
 0x1b8   : > { %570 = vst [vmem:[%s213_s18] sm:$0x3] %v566_v12  ;;  %v567_v13 = vsel %vm565_vm0, %v560_v51, %v554_v11 }
 0x1b9   : > { %571 = vst [vmem:[%s213_s18 + $0x2] sm:$0x3] %v567_v13 }
 0x1bf   : > { %v597_v14 = vld [vmem:[%s213_s18] sm:$0x3] }
 0x1c0   : > { %v599_v15 = vld [vmem:[%s213_s18 + $0x2] sm:$0x3]  ;;  %598 = vst [vmem:[%s580_s11] sm:$0x3] %v597_v14 }
 0x1c1   : > { %600 = vst [vmem:[%s580_s11 + $0x8] sm:$0x3] %v599_v15 }
 0x1c2 PF: > { %p14_p7 = scmp.ge.s32.totalorder %s994_s20, 6   ;;  %s1175_s15 = smov %s935_s16 }
 0x1c3   : > { %s1176_s16 = smov %s939_s17  ;;  %s1177_s17 = smov %s1004_s23 }
 0x1c4   : > { %s1178_s18 = smov %s994_s20  ;;  %16 = sbr.rel (!%p14_p7) target bundleno = 3 (0x3), region = 110 }
 0x1c9   :  { %630 = vsyncpa [#allocation3], 1 }
 0x1ca   :  { %632 = vsyncpa [#allocation3 + $0x1], 1 }

// kernel: cross_lingual_forward.2
= control target key start
LH: loop header
LB: loop body
LE: loop exit
PB: predicated region body
PF: predicated region fallthrough
CT: control target
= control target key end

     0   :  { %19 = vsyncpa [#allocation3], 0  ;;  %s2519_s0 = inlined_call_operand.vmem [shape: f32[2,8,128], index: 0, kind: input, shape index: {}]   ;;  %s2520_s1 = inlined_call_operand.vmem [shape: f32[2,1,8], index: 1, kind: input, shape index: {}]   ;;  %s2521_s2 = inlined_call_operand.hbm [shape: bf16[384,128], index: 2, kind: input, shape index: {}]   ;;  %s2522_s3 = inlined_call_operand.hbm [shape: f32[1,384], index: 3, kind: input, shape index: {}]   ;;  %s2523_s4 = inlined_call_operand.hbm [shape: bf16[128,128], index: 4, kind: input, shape index: {}]   ;;  %s2524_s5 = inlined_call_operand.hbm [shape: f32[1,128], index: 5, kind: input, shape index: {}]   ;;  %s2525_s6 = inlined_call_operand.hbm [shape: f32[1,128], index: 6, kind: input, shape index: {}]   ;;  %s2526_s7 = inlined_call_operand.hbm [shape: f32[1,128], index: 7, kind: input, shape index: {}]   ;;  %s2527_s8 = inlined_call_operand.hbm [shape: bf16[512,128], index: 8, kind: input, shape index: {}]   ;;  %s2528_s9 = inlined_call_operand.hbm [shape: f32[1,512], index: 9, kind: input, shape index: {}]   ;;  %s2529_s10 = inlined_call_operand.hbm [shape: bf16[128,512], index: 10, kind: input, shape index: {}]   ;;  %s2530_s11 = inlined_call_operand.hbm [shape: f32[1,128], index: 11, kind: input, shape index: {}]   ;;  %s2531_s12 = inlined_call_operand.hbm [shape: f32[1,128], index: 12, kind: input, shape index: {}]   ;;  %s2532_s13 = inlined_call_operand.hbm [shape: f32[1,128], index: 13, kind: input, shape index: {}]   ;;  %s2533_s14 = inlined_call_operand.vmem [shape: f32[2,8,128], index: 14, kind: output, shape index: {}]  }
   0x1   :  { %20 = vsyncpa [#allocation5], 0 }
   0x2   :  { %21 = vsyncpa [#allocation8], 0 }
   0x3   :  { %22 = vsyncpa [#allocation11], 0 }
   0x4   :  { %23 = vsyncpa [#allocation14], 0 }
   0x5   :  { %24 = vsyncpa [#allocation17], 0  ;;  %s48_s15 = sshll.u32 %s2522_s3, 4  ;;  %s49_s15 = int_to_ptr.hbm [resolvable:$true] %s48_s15 }
   0x6   :  { %25 = vsyncpa [#allocation20], 0  ;;  %s2277_s16 = smov [#allocation4]   ;;  %s72_s20 = sshll.u32 %s2524_s5, 4  ;;  %s73_s20 = int_to_ptr.hbm [resolvable:$true] %s72_s20 }
   0x7   :  { %s50_s17 = sshll.u32 %s2277_s16, 4  ;;  %s2278_s21 = smov [#allocation7]   ;;  %s51_s17 = int_to_ptr.vmem [resolvable:$true] %s50_s17 }
   0x8   :  { %53 = dma.hbm_to_vmem [thread:$0]  %s49_s15, 48, %s51_s17, [#allocation5]  }
   0x9   :  { %s74_s22 = sshll.u32 %s2278_s21, 4  ;;  %s94_s25 = sshll.u32 %s2526_s7, 4  ;;  %s75_s22 = int_to_ptr.vmem [resolvable:$true] %s74_s22  ;;  %s95_s25 = int_to_ptr.hbm [resolvable:$true] %s94_s25 }
   0xa   :  { %77 = dma.hbm_to_vmem [thread:$0]  %s73_s20, 16, %s75_s22, [#allocation8]  }
   0xb   :  { %s118_s27 = sshll.u32 %s2528_s9, 4  ;;  %s2279_s28 = smov [#allocation10]   ;;  %s119_s27 = int_to_ptr.hbm [resolvable:$true] %s118_s27 }
   0xc   :  { %s96_s29 = sshll.u32 %s2279_s28, 4  ;;  %s2280_s5 = smov [#allocation13]   ;;  %s97_s29 = int_to_ptr.vmem [resolvable:$true] %s96_s29 }
   0xd   :  { %99 = dma.hbm_to_vmem [thread:$0]  %s95_s25, 16, %s97_s29, [#allocation11]  }
   0xe   :  { %s120_s30 = sshll.u32 %s2280_s5, 4  ;;  %s142_s17 = sshll.u32 %s2530_s11, 4  ;;  %s121_s30 = int_to_ptr.vmem [resolvable:$true] %s120_s30  ;;  %s143_s17 = int_to_ptr.hbm [resolvable:$true] %s142_s17 }
   0xf   :  { %123 = dma.hbm_to_vmem [thread:$0]  %s119_s27, 64, %s121_s30, [#allocation14]  }
  0x10   :  { %s34_s19 = sshll.u32 %s2521_s2, 4  ;;  %s2281_s20 = smov [#allocation16]   ;;  %s35_s19 = int_to_ptr.hbm [resolvable:$true] %s34_s19 }
  0x11   :  { %s144_s9 = sshll.u32 %s2281_s20, 4  ;;  %s2282_s21 = smov [#allocation2]   ;;  %s145_s9 = int_to_ptr.vmem [resolvable:$true] %s144_s9 }
  0x12   :  { %147 = dma.hbm_to_vmem [thread:$0]  %s143_s17, 16, %s145_s9, [#allocation17]  }
  0x13   :  { %s36_s22 = sshll.u32 %s2282_s21, 4  ;;  %s2283_s23 = smov 64   ;;  %s37_s22 = int_to_ptr.vmem [resolvable:$true] %s36_s22 }
  0x14   :  { %s2284_s24 = smov 4   ;;  %s58_s3 = sshll.u32 %s2523_s4, 4  ;;  %s59_s3 = int_to_ptr.hbm [resolvable:$true] %s58_s3 }
  0x15   :  { %42 = dma.hbm_to_vmem [thread:$0]  %s35_s19, 3072, %s37_s22, [#allocation3], %s2283_s23, %s2283_s23, %s2284_s24  }
  0x16   :  { %s2285_s26 = smov [#allocation6]   ;;  %s83_s29 = sshll.u32 %s2525_s6, 4  ;;  %s84_s29 = int_to_ptr.hbm [resolvable:$true] %s83_s29 }
  0x17   :  { %s60_s27 = sshll.u32 %s2285_s26, 4  ;;  %s2286_s5 = smov [#allocation9]   ;;  %s61_s27 = int_to_ptr.vmem [resolvable:$true] %s60_s27 }
  0x18   :  { %66 = dma.hbm_to_vmem [thread:$0]  %s59_s3, 1024, %s61_s27, [#allocation5], %s2283_s23, %s2283_s23, %s2284_s24  }
  0x19   :  { %s85_s30 = sshll.u32 %s2286_s5, 4  ;;  %s104_s17 = sshll.u32 %s2527_s8, 4  ;;  %s86_s30 = int_to_ptr.vmem [resolvable:$true] %s85_s30  ;;  %s105_s17 = int_to_ptr.hbm [resolvable:$true] %s104_s17 }
  0x1a   :  { %88 = dma.hbm_to_vmem [thread:$0]  %s84_s29, 16, %s86_s30, [#allocation8]  }
  0x1b   :  { %s128_s18 = sshll.u32 %s2529_s10, 4  ;;  %s2287_s19 = smov [#allocation12]   ;;  %s129_s18 = int_to_ptr.hbm [resolvable:$true] %s128_s18 }
  0x1c   :  { %s106_s20 = sshll.u32 %s2287_s19, 4  ;;  %s2288_s6 = smov [#allocation15]   ;;  %s107_s20 = int_to_ptr.vmem [resolvable:$true] %s106_s20 }
  0x1d   :  { %112 = dma.hbm_to_vmem [thread:$0]  %s105_s17, 4096, %s107_s20, [#allocation11], %s2283_s23, %s2283_s23, %s2284_s24  }
  0x1e   :  { %s130_s9 = sshll.u32 %s2288_s6, 4  ;;  %s2289_s21 = smov 256   ;;  %s131_s9 = int_to_ptr.vmem [resolvable:$true] %s130_s9 }
  0x1f   :  { %s2290_s22 = smov 16   ;;  %s153_s11 = sshll.u32 %s2531_s12, 4  ;;  %s154_s11 = int_to_ptr.hbm [resolvable:$true] %s153_s11 }
  0x20   :  { %136 = dma.hbm_to_vmem [thread:$0]  %s129_s18, 4096, %s131_s9, [#allocation14], %s2289_s21, %s2289_s21, %s2290_s22  }
  0x21   :  { %s2291_s3 = smov [#allocation18]   ;;  %s164_s2 = sshll.u32 %s2532_s13, 4  ;;  %s165_s2 = int_to_ptr.hbm [resolvable:$true] %s164_s2 }
  0x22   :  { %s155_s26 = sshll.u32 %s2291_s3, 4  ;;  %s2292_s23 = smov [#allocation19]   ;;  %s156_s26 = int_to_ptr.vmem [resolvable:$true] %s155_s26 }
  0x23   :  { %158 = dma.hbm_to_vmem [thread:$0]  %s154_s11, 16, %s156_s26, [#allocation17]  }
  0x24   :  { %s166_s24 = sshll.u32 %s2292_s23, 4  ;;  %s167_s24 = int_to_ptr.vmem [resolvable:$true] %s166_s24 }
  0x25   :  { %169 = dma.hbm_to_vmem [thread:$0]  %s165_s2, 16, %s167_s24, [#allocation20]  }
  0x26   :  { %2263 = dma.done.wait [#allocation3], 3072  }
  0x27   :  { %2264 = vsyncadd [#allocation3], 4294964224 }
  0x28   :  { %2265 = dma.done.wait [#allocation5], 1072  }
  0x29   :  { %2266 = vsyncadd [#allocation5], 4294966224 }
  0x2a   :  { %2267 = dma.done.wait [#allocation8], 32  }
  0x2b   :  { %2268 = vsyncadd [#allocation8], 4294967264 }
  0x2c   :  { %2269 = dma.done.wait [#allocation11], 4112  }
  0x2d   :  { %2270 = vsyncadd [#allocation11], 4294963184 }
  0x2e   :  { %2271 = dma.done.wait [#allocation14], 4160  }
  0x2f   :  { %2272 = vsyncadd [#allocation14], 4294963136 }
  0x30   :  { %2273 = dma.done.wait [#allocation17], 32  }
  0x31   :  { %2274 = vsyncadd [#allocation17], 4294967264 }
  0x32   :  { %2275 = dma.done.wait [#allocation20], 16  }
  0x33   :  { %2276 = vsyncadd [#allocation20], 4294967280  ;;  %v1835_v0 = vld [vmem:[#allocation2 + $0x78] sm:$0xff]  ;;  %v1834_v2 = vld [vmem:[#allocation2 + $0x70] sm:$0xff]  ;;  %vm625_vm0 = vcmask 64512   ;;  %vm655_vm1 = vcmask 1043456  }
  0x34   :  { %v1827_v1 = vld [vmem:[#allocation2 + $0x38] sm:$0xff]  ;;  %557 = vmatpush.bf16.xpose.msra.mxu1 %v1835_v0  ;;  %v1826_v3 = vld [vmem:[#allocation2 + $0x30] sm:$0xff]  ;;  %v1833_v4 = vld [vmem:[#allocation2 + $0x68] sm:$0xff] }
  0x35   :  { %543 = vmatpush.bf16.xpose.msra.mxu0 %v1827_v1  ;;  %v1825_v5 = vld [vmem:[#allocation2 + $0x28] sm:$0xff]  ;;  %v1832_v6 = vld [vmem:[#allocation2 + $0x60] sm:$0xff]  ;;  %v1831_v8 = vld [vmem:[#allocation2 + $0x58] sm:$0xff] }
  0x36   :  { %v1824_v7 = vld [vmem:[#allocation2 + $0x20] sm:$0xff]  ;;  %v1823_v9 = vld [vmem:[#allocation2 + $0x18] sm:$0xff]  ;;  %v1830_v10 = vld [vmem:[#allocation2 + $0x50] sm:$0xff] }
  0x37   :  { %v1822_v11 = vld [vmem:[#allocation2 + $0x10] sm:$0xff]  ;;  %v1829_v12 = vld [vmem:[#allocation2 + $0x48] sm:$0xff]  ;;  %v1828_v14 = vld [vmem:[#allocation2 + $0x40] sm:$0xff] }
  0x38   :  { %v1821_v13 = vld [vmem:[#allocation2 + $0x8] sm:$0xff]  ;;  %v1820_v15 = vld [vmem:[#allocation2] sm:$0xff]  ;;  %v1843_v34 = vld [vmem:[#allocation2 + $0xb8] sm:$0xff] }
  0x39   :  { %v2408_v16 = vld [vmem:[%s2519_s0] sm:$0xff]  ;;  %v2413_v17 = vld [vmem:[%s2519_s0 + $0x8] sm:$0xff]  ;;  %571 = vmatpush.bf16.xpose.msra.mxu2 %v1843_v34  ;;  %v1842_v35 = vld [vmem:[#allocation2 + $0xb0] sm:$0xff] }
  0x3a   :  { %v391_v18 = vpack.c.bf16 %v2413_v17, %v2408_v16  ;;  %v2417_v19 = vld [vmem:[#allocation4] sm:$0x7]  ;;  %v1841_v36 = vld [vmem:[#allocation2 + $0xa8] sm:$0xff]  ;;  %v1839_v49 = vld [vmem:[#allocation2 + $0x98] sm:$0xff] }
  0x3b   :  { %v394_v20 = vperm.slane %v2417_v19, 1  ;;  %v393_v22 = vperm.slane %v2417_v19, 0  ;;  %v1933_v37 = vld [vmem:[%s2520_s1] ss:$0 sm:$0xff]  ;;  %v1934_v43 = vld [vmem:[%s2520_s1 + $0x1] ss:$0 sm:$0xff] }
  0x3c   :  { %558 = vmatpush.bf16.xpose.msra.mxu1 %v1834_v2  ;;  %v1840_v42 = vld [vmem:[#allocation2 + $0xa0] sm:$0xff]  ;;  %v1838_v51 = vld [vmem:[#allocation2 + $0x90] sm:$0xff]  ;;  %v1837_v52 = vld [vmem:[#allocation2 + $0x88] sm:$0xff]  ;;  %v395_v1 = vperm.slane %v2417_v19, 2 }
  0x3d   :  { %544 = vmatpush.bf16.xpose.msra.mxu0 %v1826_v3  ;;  %v1836_v53 = vld [vmem:[#allocation2 + $0x80] sm:$0xff] }
  0x3e   :  { %v1848_v19 = vld [vmem:[#allocation6 + $0x20] sm:$0xff] }
  0x41   :  { %572 = vmatpush.bf16.xpose.msra.mxu2 %v1842_v35 }
  0x44   :  { %559 = vmatpush.bf16.xpose.msra.mxu1 %v1833_v4 }
  0x45   :  { %545 = vmatpush.bf16.xpose.msra.mxu0 %v1825_v5 }
  0x49   :  { %573 = vmatpush.bf16.xpose.msra.mxu2 %v1841_v36 }
  0x4c   :  { %560 = vmatpush.bf16.xpose.msra.mxu1 %v1832_v6 }
  0x4d   :  { %546 = vmatpush.bf16.xpose.msra.mxu0 %v1824_v7 }
  0x51   :  { %574 = vmatpush.bf16.xpose.msra.mxu2 %v1840_v42  ;;  %v1859_v42 = vld [vmem:[#allocation12 + $0x38] sm:$0xff] }
  0x54   :  { %561 = vmatpush.bf16.xpose.msra.mxu1 %v1831_v8 }
  0x55   :  { %547 = vmatpush.bf16.xpose.msra.mxu0 %v1823_v9  ;;  %v1851_v9 = vld [vmem:[#allocation6 + $0x38] sm:$0xff] }
  0x59   :  { %575 = vmatpush.bf16.xpose.msra.mxu2 %v1839_v49  ;;  %v1874_v49 = vld [vmem:[#allocation12 + $0xb0] sm:$0xff] }
  0x5c   :  { %562 = vmatpush.bf16.xpose.msra.mxu1 %v1830_v10  ;;  %v1850_v10 = vld [vmem:[#allocation6 + $0x30] sm:$0xff] }
  0x5d   :  { %548 = vmatpush.bf16.xpose.msra.mxu0 %v1822_v11 }
  0x61   :  { %576 = vmatpush.bf16.xpose.msra.mxu2 %v1838_v51  ;;  %v1857_v51 = vld [vmem:[#allocation12 + $0x28] sm:$0xff] }
  0x64   :  { %563 = vmatpush.bf16.xpose.msra.mxu1 %v1829_v12  ;;  %v1849_v12 = vld [vmem:[#allocation6 + $0x28] sm:$0xff] }
  0x65   :  { %549 = vmatpush.bf16.xpose.msra.mxu0 %v1821_v13 }
  0x69   :  { %577 = vmatpush.bf16.xpose.msra.mxu2 %v1837_v52  ;;  %v1865_v52 = vld [vmem:[#allocation12 + $0x68] sm:$0xff] }
  0x6c   :  { %564 = vmatpush.bf16.xpose.msra.mxu1 %v1828_v14 }
  0x6d   :  { %550 = vmatpush.bf16.xpose.msra.mxu0 %v1820_v15 }
  0x71   :  { %578 = vmatpush.bf16.xpose.msra.mxu2 %v1836_v53 }
  0x73   :  { %565 = vmatmul.bf16.vlgmr.msra.gmra.mxu1 %v391_v18 }
  0x74   :  { %551 = vmatmul.bf16.vlgmr.msra.gmra.mxu0 %v391_v18 }
  0x78   :  { %579 = vmatmul.bf16.vlgmr.msra.gmra.mxu2 %v391_v18 }
  0xf0   :  { %v566_v21 = vpop.f32.mrf.mxu1 }
  0xf1   :  { %v567_v23 = vadd.f32 %v566_v21, %v394_v20  ;;  %v552_v24 = vpop.f32.mrf.mxu0 }
  0xf2   :  { %v553_v26 = vadd.f32 %v552_v24, %v393_v22  ;;  %v1846_v24 = vld [vmem:[#allocation6 + $0x10] sm:$0xff] }
  0xf3   :  { %v587_v25 = vpack.c.bf16 %v567_v23, %v567_v23  ;;  %v1847_v23 = vld [vmem:[#allocation6 + $0x18] sm:$0xff] }
  0xf4   :  { %v585_v27 = vpack.c.bf16 %v553_v26, %v553_v26  ;;  %v1844_v26 = vld [vmem:[#allocation6] sm:$0xff] }
  0xf5   :  { %596 = vmatpush.bf16.xpose.msrb.mxu0 %v587_v25  ;;  %v1845_v25 = vld [vmem:[#allocation6 + $0x8] sm:$0xff] }
  0xf8   :  { %v568_v28 = vpop.f32.mrf.mxu1 }
  0xf9   :  { %v569_v29 = vadd.f32 %v568_v28, %v394_v20  ;;  %v554_v31 = vpop.f32.mrf.mxu0 }
  0xfa   :  { %v555_v32 = vadd.f32 %v554_v31, %v393_v22 }
  0xfb   :  { %v588_v30 = vpack.c.bf16 %v569_v29, %v569_v29  ;;  %v580_v0 = vpop.f32.mrf.mxu2 }
  0xfc   :  { %597 = vmatmul.bf16.vlgmr.msrb.gmra.mxu0 %v585_v27  ;;  %v586_v33 = vpack.c.bf16 %v555_v32, %v555_v32  ;;  %v581_v2 = vadd.f32 %v580_v0, %v395_v1  ;;  %v1935_v32 = vld [vmem:[#allocation7] ss:$0 sm:$0xff] }
  0xfd   :  { %609 = vmatpush.bf16.xpose.msrb.mxu1 %v588_v30  ;;  %1018 = vmatpush.bf16.xpose.msra.mxu0 %v1859_v42  ;;  %v1790_v42 = vld [vmem:[#allocation15 + $0xc0] sm:$0xf] }
  0xfe   :  { %v650_v4 = vpack.c.bf16 %v581_v2, %v581_v2 }
 0x100   :  { %v657_v7 = vsel %vm655_vm1, %v650_v4, 0  ;;  %v1855_v4 = vld [vmem:[#allocation12 + $0x18] sm:$0xff] }
 0x101   :  { %666 = vmatpush.bf16.msrb.mxu2 %v657_v7  ;;  %v1879_v7 = vld [vmem:[#allocation12 + $0xd8] sm:$0xff] }
 0x103   :  { %v582_v3 = vpop.f32.mrf.mxu2 }
 0x104   :  { %610 = vmatmul.bf16.vlgmr.msrb.gmra.mxu1 %v586_v33  ;;  %v583_v5 = vadd.f32 %v582_v3, %v395_v1 }
 0x106   :  { %v651_v6 = vpack.c.bf16 %v583_v5, %v583_v5  ;;  %v1863_v5 = vld [vmem:[#allocation12 + $0x58] sm:$0xff] }
 0x108   :  { %v676_v8 = vsel %vm655_vm1, %v651_v6, 0  ;;  %v1871_v6 = vld [vmem:[#allocation12 + $0x98] sm:$0xff] }
 0x109   :  { %685 = vmatpush.bf16.msra.mxu3 %v676_v8  ;;  %v1854_v8 = vld [vmem:[#allocation12 + $0x10] sm:$0xff] }
 0x10d   :  { %743 = vmatpush.bf16.xpose.msrb.mxu3 %v1851_v9  ;;  %v1862_v9 = vld [vmem:[#allocation12 + $0x50] sm:$0xff] }
 0x115   :  { %744 = vmatpush.bf16.xpose.msrb.mxu3 %v1850_v10  ;;  %v1870_v10 = vld [vmem:[#allocation12 + $0x90] sm:$0xff] }
 0x11d   :  { %745 = vmatpush.bf16.xpose.msrb.mxu3 %v1849_v12  ;;  %v1853_v12 = vld [vmem:[#allocation12 + $0x8] sm:$0xff] }
 0x125   :  { %746 = vmatpush.bf16.xpose.msrb.mxu3 %v1848_v19  ;;  %v1860_v19 = vld [vmem:[#allocation12 + $0x40] sm:$0xff] }
 0x12d   :  { %747 = vmatpush.bf16.xpose.msrb.mxu3 %v1847_v23 }
 0x135   :  { %748 = vmatpush.bf16.xpose.msrb.mxu3 %v1846_v24 }
 0x13d   :  { %749 = vmatpush.bf16.xpose.msrb.mxu3 %v1845_v25 }
 0x145   :  { %750 = vmatpush.bf16.xpose.msrb.mxu3 %v1844_v26  ;;  %v1806_v26 = vld [vmem:[#allocation15 + $0xe0] sm:$0xf] }
 0x179   :  { %v598_v38 = vpop.f32.mrf.mxu0 }
 0x17a   :  { %v615_v39 = vmul.f32 0.088388346, %v598_v38 }
 0x17c   :  { %v623_v40 = vadd.f32 %v1933_v37, %v615_v39  ;;  %v2293_v39 = vmov 128.0  }
 0x17e   :  { %v626_v41 = vsel %vm625_vm0, %v623_v40, -inf }
 0x17f   :  { %627 = vmax.xlane.f32.xlu0 %v626_v41 }
 0x181   :  { %v611_v44 = vpop.f32.mrf.mxu1  ;;  %v600_v45 = vpop.f32.mrf.mxu0 }
 0x182   :  { %v616_v46 = vmul.f32 0.088388346, %v611_v44  ;;  %v1875_v44 = vld [vmem:[#allocation12 + $0xb8] sm:$0xff] }
 0x183   :  { %v1883_v45 = vld [vmem:[#allocation12 + $0xf8] sm:$0xff]  ;;  %1046 = vmatpush.bf16.xpose.msra.mxu2 %v1875_v44  ;;  %v1908_v44 = vld [vmem:[#allocation15 + $0xc4] sm:$0xf] }
 0x184   :  { %v624_v47 = vadd.f32 %v1934_v43, %v616_v46  ;;  %v1867_v43 = vld [vmem:[#allocation12 + $0x78] sm:$0xff] }
 0x185   :  { %1032 = vmatpush.bf16.xpose.msra.mxu1 %v1867_v43  ;;  %v1910_v43 = vld [vmem:[#allocation15 + $0xcc] sm:$0xf0] }
 0x186   :  { %v629_v48 = vsel %vm625_vm0, %v624_v47, -inf }
 0x187   :  { %630 = vmax.xlane.f32.xlu0 %v629_v48 }
 0x189   :  { %v613_v50 = vpop.f32.mrf.mxu1 }
 0x18a   :  { %v1882_v50 = vld [vmem:[#allocation12 + $0xf0] sm:$0xff] }
 0x18b   :  { %1047 = vmatpush.bf16.xpose.msra.mxu2 %v1874_v49  ;;  %v1800_v49 = vld [vmem:[#allocation15 + $0xd8] sm:$0xf0] }
 0x1f2   :  { %v628_v54 = vpop.xlane.xlu0 %627 }
 0x1f3   :  { %v632_v55 = vsub.f32 %v623_v40, %v628_v54  ;;  %v1873_v54 = vld [vmem:[#allocation12 + $0xa8] sm:$0xff] }
 0x1f4   :  { %1048 = vmatpush.bf16.xpose.msra.mxu2 %v1873_v54 }
 0x1f5   :  { %v634_v56 = vmul.f32 1.442695, %v632_v55  ;;  %v1881_v55 = vld [vmem:[#allocation12 + $0xe8] sm:$0xff] }
 0x1f7   :  { %1941 = vpow2.f32 %v634_v56 }
 0x1fa   :  { %v631_v57 = vpop.xlane.xlu0 %630 }
 0x1fb   :  { %v633_v58 = vsub.f32 %v624_v47, %v631_v57  ;;  %v1866_v47 = vld [vmem:[#allocation12 + $0x70] sm:$0xff] }
 0x1fc   :  { %1033 = vmatpush.bf16.xpose.msra.mxu1 %v1866_v47 }
 0x1fd   :  { %v1942_v59 = vpop.eup %1941  ;;  %v636_v60 = vmul.f32 1.442695, %v633_v58 }
 0x1fe   :  { %v638_v61 = vsel %vm625_vm0, %v1942_v59, 0.0 }
 0x1ff   :  { %1943 = vpow2.f32 %v636_v60  ;;  %639 = vadd.xlane.f32.xlu1 %v638_v61  ;;  %v1856_v60 = vld [vmem:[#allocation12 + $0x20] sm:$0xff] }
 0x200   :  { %v1864_v61 = vld [vmem:[#allocation12 + $0x60] sm:$0xff] }
 0x204   :  { %1034 = vmatpush.bf16.xpose.msra.mxu1 %v1865_v52 }
 0x205   :  { %v1944_v62 = vpop.eup %1943 }
 0x206   :  { %v641_v63 = vsel %vm625_vm0, %v1944_v62, 0.0 }
 0x207   :  { %642 = vadd.xlane.f32.xlu1 %v641_v63  ;;  %v1880_v63 = vld [vmem:[#allocation12 + $0xe0] sm:$0xff] }
 0x20c   :  { %1035 = vmatpush.bf16.xpose.msra.mxu1 %v1864_v61  ;;  %v1906_v61 = vld [vmem:[#allocation15 + $0xac] sm:$0xf0] }
 0x214   :  { %1036 = vmatpush.bf16.xpose.msra.mxu1 %v1863_v5  ;;  %v1784_v5 = vld [vmem:[#allocation15 + $0xb8] sm:$0xf0] }
 0x21c   :  { %1037 = vmatpush.bf16.xpose.msra.mxu1 %v1862_v9 }
 0x272   :  { %v640_v11 = vpop.xlane.xlu1 %639 }
 0x273   :  { %1945 = vrcp.f32 %v640_v11  ;;  %v1878_v11 = vld [vmem:[#allocation12 + $0xd0] sm:$0xff] }
 0x279   :  { %v1946_v13 = vpop.eup %1945 }
 0x27a   :  { %v646_v14 = vmul.f32 %v1946_v13, %v1942_v59  ;;  %v643_v15 = vpop.xlane.xlu1 %642  ;;  %v1861_v13 = vld [vmem:[#allocation12 + $0x48] sm:$0xff] }
 0x27b   :  { %1947 = vrcp.f32 %v643_v15  ;;  %v1877_v15 = vld [vmem:[#allocation12 + $0xc8] sm:$0xff]  ;;  %1038 = vmatpush.bf16.xpose.msra.mxu1 %v1861_v13 }
 0x27c   :  { %v648_v18 = vpack.c.bf16 %v646_v14, %v646_v14  ;;  %1949 = vrcp.f32 %v2293_v39  ;;  %v1869_v14 = vld [vmem:[#allocation12 + $0x88] sm:$0xff] }
 0x27e   :  { %1530 = vmatmul.msk.bf16.vlgmr.msrb.gmra.mxu2 %vm625_vm0, %v648_v18  ;;  %v1852_v18 = vld [vmem:[#allocation12] sm:$0xff] }
 0x281   :  { %v1948_v20 = vpop.eup %1947 }
 0x282   :  { %v647_v21 = vmul.f32 %v1948_v20, %v1944_v62  ;;  %v1950_v40 = vpop.eup %1949  ;;  %v1872_v62 = vld [vmem:[#allocation12 + $0xa0] sm:$0xff] }
 0x283   :  { %v764_v41 = vmul.f32 128.0, %v1950_v40  ;;  %vm768_vm2 = vweird.f32 %v1950_v40  ;;  %1049 = vmatpush.bf16.xpose.msra.mxu2 %v1872_v62  ;;  %v1868_v20 = vld [vmem:[#allocation12 + $0x80] sm:$0xff]  ;;  %1039 = vmatpush.bf16.xpose.msra.mxu1 %v1860_v19  ;;  %v1904_v62 = vld [vmem:[#allocation15 + $0xa4] sm:$0xf]  ;;  %v1902_v19 = vld [vmem:[#allocation15 + $0x8c] sm:$0xf0] }
 0x284   :  { %v649_v22 = vpack.c.bf16 %v647_v21, %v647_v21  ;;  %v1876_v21 = vld [vmem:[#allocation12 + $0xc0] sm:$0xff] }
 0x285   :  { %v765_v46 = vsub.f32 1.0, %v764_v41 }
 0x286   :  { %1531 = vmatmul.msk.bf16.vlgmr.msra.gmra.mxu3 %vm625_vm0, %v649_v22 }
 0x287   :  { %1060 = vmatpush.bf16.xpose.msra.mxu3 %v1883_v45  ;;  %v766_v48 = vmul.f32 %v1950_v40, %v765_v46  ;;  %v1792_v45 = vld [vmem:[#allocation15 + $0xd0] sm:$0xf0]  ;;  %v1798_v46 = vld [vmem:[#allocation15 + $0xc8] sm:$0xf] }
 0x28b   :  { %1050 = vmatpush.bf16.xpose.msra.mxu2 %v1871_v6 }
 0x28f   :  { %1061 = vmatpush.bf16.xpose.msra.mxu3 %v1882_v50  ;;  %v1791_v50 = vor.u32 %v1910_v43, %v1790_v42  ;;  %v1750_v42 = vld [vmem:[#allocation15 + $0x68] sm:$0xf]  ;;  %v1899_v43 = vld [vmem:[#allocation15 + $0x74] sm:$0xf0] }
 0x293   :  { %1051 = vmatpush.bf16.xpose.msra.mxu2 %v1870_v10 }
 0x297   :  { %1062 = vmatpush.bf16.xpose.msra.mxu3 %v1881_v55 }
 0x29b   :  { %1052 = vmatpush.bf16.xpose.msra.mxu2 %v1869_v14  ;;  %v1936_v14 = vld [vmem:[#allocation9] ss:$0 sm:$0xff] }
 0x29f   :  { %1063 = vmatpush.bf16.xpose.msra.mxu3 %v1880_v63  ;;  %v1776_v63 = vld [vmem:[#allocation15 + $0xb0] sm:$0xf0] }
 0x2a0   :  { %v1779_v9 = vor.u32 %v1904_v62, %v1776_v63  ;;  %v1888_v62 = vld [vmem:[#allocation15 + $0x24] sm:$0xf] }
 0x2a3   :  { %1053 = vmatpush.bf16.xpose.msra.mxu2 %v1868_v20  ;;  %v1900_v20 = vld [vmem:[#allocation15 + $0x84] sm:$0xf] }
 0x2a7   :  { %1064 = vmatpush.bf16.xpose.msra.mxu3 %v1879_v7 }
 0x2af   :  { %1065 = vmatpush.bf16.xpose.msra.mxu3 %v1878_v11 }
 0x2b7   :  { %1066 = vmatpush.bf16.xpose.msra.mxu3 %v1877_v15 }
 0x2bf   :  { %1067 = vmatpush.bf16.xpose.msra.mxu3 %v1876_v21  ;;  %v1760_v21 = vld [vmem:[#allocation15 + $0x90] sm:$0xf0] }
 0x301   :  { %v668_v27 = vpop.f32.mrf.mxu2 }
 0x309   :  { %v670_v28 = vpop.f32.mrf.mxu2  ;;  %v687_v29 = vpop.f32.mrf.mxu3 }
 0x30a   :  { %v691_v30 = vpack.c.bf16 %v687_v29, %v668_v27  ;;  %v1914_v27 = vld [vmem:[#allocation15 + $0xec] sm:$0xf0]  ;;  %v1912_v28 = vld [vmem:[#allocation15 + $0xe4] sm:$0xf] }
 0x30c   :  { %751 = vmatmul.bf16.vlgmr.msrb.gmra.mxu3 %v691_v30  ;;  %v1807_v30 = vor.u32 %v1914_v27, %v1806_v26  ;;  %v1763_v27 = vor.u32 %v1900_v20, %v1760_v21 }
 0x311   :  { %v689_v31 = vpop.f32.mrf.mxu3 }
 0x312   :  { %v1808_v31 = vld [vmem:[#allocation15 + $0xf0] sm:$0xf0] }
 0x38f   :  { %v752_v33 = vpop.f32.mrf.mxu3 }
 0x390   :  { %v753_v34 = vadd.f32 %v1935_v32, %v752_v33  ;;  %v1915_v33 = vld [vmem:[#allocation15 + $0xf4] sm:$0xf0] }
 0x392   :  { %v757_v35 = vadd.f32 %v753_v34, %v2408_v16  ;;  %v1858_v16 = vld [vmem:[#allocation12 + $0x30] sm:$0xff]  ;;  %v1811_v34 = vor.u32 %v1912_v28, %v1808_v31  ;;  %v1766_v31 = vld [vmem:[#allocation15 + $0x88] sm:$0xf] }
 0x393   :  { %1019 = vmatpush.bf16.xpose.msra.mxu0 %v1858_v16  ;;  %v1911_v16 = vld [vmem:[#allocation15 + $0xd4] sm:$0xf0] }
 0x394   :  { %759 = vadd.xlane.f32.xlu2 %v757_v35  ;;  %1327 = vmatpush.bf16.xpose.msrb.mxu1 %v1811_v34  ;;  %v1799_v52 = vor.u32 %v1911_v16, %v1798_v46  ;;  %v1768_v34 = vld [vmem:[#allocation15 + $0x98] sm:$0xf0] }
 0x395   :  { %v1752_v46 = vld [vmem:[#allocation15 + $0x78] sm:$0xf0] }
 0x397   :  { %v754_v36 = vpop.f32.mrf.mxu3 }
 0x398   :  { %v755_v37 = vadd.f32 %v1935_v32, %v754_v36  ;;  %v1814_v32 = vld [vmem:[#allocation15 + $0xe8] sm:$0xf]  ;;  %v1913_v36 = vld [vmem:[#allocation15 + $0xec] sm:$0xf] }
 0x39a   :  { %v758_v38 = vadd.f32 %v755_v37, %v2413_v17  ;;  %v767_v17 = vadd.f32 %v1950_v40, %v766_v48  ;;  %v1816_v37 = vld [vmem:[#allocation15 + $0xf8] sm:$0xf0]  ;;  %v1909_v48 = vld [vmem:[#allocation15 + $0xcc] sm:$0xf] }
 0x39b   :  { %1020 = vmatpush.bf16.xpose.msra.mxu0 %v1857_v51  ;;  %v1795_v51 = vor.u32 %v1908_v44, %v1792_v45  ;;  %v1803_v54 = vor.u32 %v1909_v48, %v1800_v49  ;;  %v1897_v44 = vld [vmem:[#allocation15 + $0x6c] sm:$0xf]  ;;  %v1751_v45 = vor.u32 %v1899_v43, %v1750_v42  ;;  %v1894_v48 = vld [vmem:[#allocation15 + $0x4c] sm:$0xf0]  ;;  %v1892_v49 = vld [vmem:[#allocation15 + $0x44] sm:$0xf] }
 0x39c   :  { %761 = vadd.xlane.f32.xlu2 %v758_v38  ;;  %v2436_v53 = vsel %vm768_vm2, %v1950_v40, %v767_v17  ;;  %v1819_v40 = vor.u32 %v1913_v36, %v1816_v37  ;;  %v1742_v36 = vld [vmem:[#allocation15 + $0x60] sm:$0xf]  ;;  %v1898_v37 = vld [vmem:[#allocation15 + $0x6c] sm:$0xf0]  ;;  %v1755_v16 = vor.u32 %v1897_v44, %v1752_v46 }
 0x39d   :  { %1328 = vmatpush.bf16.xpose.msrb.mxu1 %v1795_v51 }
 0x39e   :  { %1355 = vmatpush.bf16.xpose.msrb.mxu3 %v1819_v40  ;;  %v1744_v40 = vld [vmem:[#allocation15 + $0x70] sm:$0xf0] }
 0x3a3   :  { %1021 = vmatpush.bf16.xpose.msra.mxu0 %v1856_v60  ;;  %v1774_v60 = vld [vmem:[#allocation15 + $0xa0] sm:$0xf] }
 0x3a4   :  { %v1775_v6 = vor.u32 %v1906_v61, %v1774_v60  ;;  %v1710_v60 = vld [vmem:[#allocation15 + $0x20] sm:$0xf]  ;;  %v1890_v61 = vld [vmem:[#allocation15 + $0x2c] sm:$0xf0] }
 0x3a5   :  { %1329 = vmatpush.bf16.xpose.msrb.mxu1 %v1779_v9  ;;  %v1711_v63 = vor.u32 %v1890_v61, %v1710_v60 }
 0x3a6   :  { %1356 = vmatpush.bf16.xpose.msrb.mxu3 %v1803_v54  ;;  %v1895_v54 = vld [vmem:[#allocation15 + $0x54] sm:$0xf0] }
 0x3ab   :  { %1022 = vmatpush.bf16.xpose.msra.mxu0 %v1855_v4  ;;  %v1905_v4 = vld [vmem:[#allocation15 + $0xac] sm:$0xf] }
 0x3ac   :  { %v1787_v11 = vor.u32 %v1905_v4, %v1784_v5  ;;  %v1718_v4 = vld [vmem:[#allocation15 + $0x28] sm:$0xf]  ;;  %v1891_v5 = vld [vmem:[#allocation15 + $0x34] sm:$0xf0] }
 0x3ad   :  { %1330 = vmatpush.bf16.xpose.msrb.mxu1 %v1763_v27 }
 0x3ae   :  { %1357 = vmatpush.bf16.xpose.msrb.mxu3 %v1787_v11  ;;  %v1886_v11 = vld [vmem:[#allocation15 + $0xc] sm:$0xf0] }
 0x3b3   :  { %1023 = vmatpush.bf16.xpose.msra.mxu0 %v1854_v8 }
 0x3bb   :  { %1024 = vmatpush.bf16.xpose.msra.mxu0 %v1853_v12 }
 0x3c3   :  { %1025 = vmatpush.bf16.xpose.msra.mxu0 %v1852_v18  ;;  %v1758_v18 = vld [vmem:[#allocation15 + $0x80] sm:$0xf] }
 0x3c4   :  { %v1759_v26 = vor.u32 %v1902_v19, %v1758_v18  ;;  %v1696_v18 = vld [vmem:[#allocation15 + $0x10] sm:$0xf0] }
 0x3cb   :  { %1313 = vmatpush.bf16.xpose.msrb.mxu0 %v1807_v30 }
 0x3d3   :  { %1314 = vmatpush.bf16.xpose.msrb.mxu0 %v1791_v50 }
 0x3db   :  { %1315 = vmatpush.bf16.xpose.msrb.mxu0 %v1775_v6  ;;  %v1889_v6 = vld [vmem:[#allocation15 + $0x2c] sm:$0xf] }
 0x3e3   :  { %1316 = vmatpush.bf16.xpose.msrb.mxu0 %v1759_v26  ;;  %v1885_v26 = vld [vmem:[#allocation15 + $0xc] sm:$0xf] }
 0x407   :  { %v760_v56 = vpop.xlane.xlu2 %759 }
 0x408   :  { %v770_v57 = vmul.f32 %v2436_v53, %v760_v56 }
 0x40a   :  { %v2439_v58 = vsub.f32 %v757_v35, %v770_v57  ;;  %v1815_v35 = vor.u32 %v1915_v33, %v1814_v32  ;;  %v1901_v32 = vld [vmem:[#allocation15 + $0x8c] sm:$0xf] }
 0x40c   :  { %v774_v59 = vmul.f32 %v2439_v58, %v2439_v58  ;;  %1341 = vmatpush.bf16.xpose.msrb.mxu2 %v1815_v35  ;;  %v1771_v35 = vor.u32 %v1901_v32, %v1768_v34 }
 0x40e   :  { %776 = vadd.xlane.f32.xlu0 %v774_v59  ;;  %1358 = vmatpush.bf16.xpose.msrb.mxu3 %v1771_v35 }
 0x40f   :  { %v762_v0 = vpop.xlane.xlu2 %761 }
 0x410   :  { %v771_v1 = vmul.f32 %v2436_v53, %v762_v0  ;;  %v1782_v0 = vld [vmem:[#allocation15 + $0xa8] sm:$0xf] }
 0x412   :  { %v2444_v2 = vsub.f32 %v758_v38, %v771_v1  ;;  %v1907_v1 = vld [vmem:[#allocation15 + $0xb4] sm:$0xf0] }
 0x413   :  { %v1783_v10 = vor.u32 %v1907_v1, %v1782_v0  ;;  %v1712_v0 = vld [vmem:[#allocation15 + $0x30] sm:$0xf0] }
 0x414   :  { %v775_v3 = vmul.f32 %v2444_v2, %v2444_v2  ;;  %1342 = vmatpush.bf16.xpose.msrb.mxu2 %v1799_v52  ;;  %v1734_v52 = vld [vmem:[#allocation15 + $0x48] sm:$0xf]  ;;  %v1715_v1 = vor.u32 %v1888_v62, %v1712_v0 }
 0x416   :  { %778 = vadd.xlane.f32.xlu1 %v775_v3  ;;  %1359 = vmatpush.bf16.xpose.msrb.mxu3 %v1755_v16 }
 0x41c   :  { %1343 = vmatpush.bf16.xpose.msrb.mxu2 %v1783_v10  ;;  %v1694_v10 = vld [vmem:[#allocation15] sm:$0xf] }
 0x481   :  { %v777_v22 = vpop.xlane.xlu0 %776 }
 0x482   :  { %v780_v23 = vmul.f32 %v777_v22, %v2436_v53 }
 0x484   :  { %v782_v24 = vadd.f32 1e-05, %v780_v23 }
 0x486   :  { %1951 = vrsqrt.f32 %v782_v24  ;;  %vm790_vm4 = vweird.f32 %v782_v24 }
 0x489   :  { %v779_v25 = vpop.xlane.xlu1 %778 }
 0x48a   :  { %v781_v29 = vmul.f32 %v779_v25, %v2436_v53  ;;  %v1937_v25 = vld [vmem:[#allocation10] ss:$0 sm:$0xff] }
 0x48c   :  { %v1952_v38 = vpop.eup %1951  ;;  %v783_v39 = vadd.f32 1e-05, %v781_v29 }
 0x48d   :  { %v785_v41 = vmul.f32 %v1952_v38, %v782_v24  ;;  %vm791_vm3 = vweird.f32 %v1952_v38 }
 0x48e   :  { %1953 = vrsqrt.f32 %v783_v39  ;;  %vm792_vm5 = vmor %vm790_vm4, %vm791_vm3  ;;  %vm800_vm7 = vweird.f32 %v783_v39 }
 0x48f   :  { %v786_v47 = vmul.f32 %v1952_v38, %v785_v41 }
 0x491   :  { %v787_v17 = vmul.f32 0.5, %v786_v47  ;;  %v1726_v47 = vld [vmem:[#allocation15 + $0x40] sm:$0xf] }
 0x492   :  { %v1727_v50 = vor.u32 %v1894_v48, %v1726_v47 }
 0x493   :  { %v788_v55 = vsub.f32 1.5, %v787_v17  ;;  %v1728_v17 = vld [vmem:[#allocation15 + $0x50] sm:$0xf0] }
 0x494   :  { %v1954_v56 = vpop.eup %1953  ;;  %v1731_v51 = vor.u32 %v1892_v49, %v1728_v17 }
 0x495   :  { %v789_v57 = vmul.f32 %v1952_v38, %v788_v55  ;;  %v795_v59 = vmul.f32 %v1954_v56, %v783_v39  ;;  %vm801_vm6 = vweird.f32 %v1954_v56  ;;  %v1743_v39 = vor.u32 %v1898_v37, %v1742_v36  ;;  %v1893_v55 = vld [vmem:[#allocation15 + $0x4c] sm:$0xf] }
 0x496   :  { %vm802_vm8 = vmor %vm800_vm7, %vm801_vm6 }
 0x497   :  { %v796_v3 = vmul.f32 %v1954_v56, %v795_v59  ;;  %v793_v7 = vsel %vm792_vm5, %v1952_v38, %v789_v57  ;;  %v1896_v38 = vld [vmem:[#allocation15 + $0x64] sm:$0xf]  ;;  %1317 = vmatpush.bf16.xpose.msrb.mxu0 %v1743_v39  ;;  %v1736_v57 = vld [vmem:[#allocation15 + $0x58] sm:$0xf0] }
 0x498   :  { %v804_v13 = vmul.f32 %v793_v7, %v2439_v58  ;;  %v1747_v41 = vor.u32 %v1896_v38, %v1744_v40  ;;  %v1739_v59 = vor.u32 %v1893_v55, %v1736_v57  ;;  %v1719_v7 = vor.u32 %v1891_v5, %v1718_v4 }
 0x499   :  { %v797_v8 = vmul.f32 0.5, %v796_v3  ;;  %v2459_v3 = vld [vmem:[#allocation13] sm:$0xf] }
 0x49a   :  { %v809_v24 = vmul.f32 %v1936_v14, %v804_v13  ;;  %1331 = vmatpush.bf16.xpose.msrb.mxu1 %v1747_v41  ;;  %1360 = vmatpush.bf16.xpose.msrb.mxu3 %v1739_v59  ;;  %v818_v13 = vperm.slane %v2459_v3, 0  ;;  %v821_v32 = vperm.slane %v2459_v3, 3 }
 0x49b   :  { %v798_v12 = vsub.f32 1.5, %v797_v8  ;;  %v1720_v8 = vld [vmem:[#allocation15 + $0x38] sm:$0xf0] }
 0x49c   :  { %v2453_v28 = vadd.f32 %v1937_v25, %v809_v24  ;;  %v1723_v9 = vor.u32 %v1889_v6, %v1720_v8  ;;  %v1702_v24 = vld [vmem:[#allocation15 + $0x8] sm:$0xf] }
 0x49d   :  { %v799_v15 = vmul.f32 %v1954_v56, %v798_v12  ;;  %v1884_v12 = vld [vmem:[#allocation15 + $0x4] sm:$0xf] }
 0x49e   :  { %v1699_v19 = vor.u32 %v1884_v12, %v1696_v18 }
 0x49f   :  { %v803_v22 = vsel %vm802_vm8, %v1954_v56, %v799_v15  ;;  %1318 = vmatpush.bf16.xpose.msrb.mxu0 %v1727_v50  ;;  %v1735_v56 = vor.u32 %v1895_v54, %v1734_v52  ;;  %v1695_v15 = vor.u32 %v1886_v11, %v1694_v10 }
 0x4a0   :  { %v805_v23 = vmul.f32 %v803_v22, %v2444_v2  ;;  %v1903_v2 = vld [vmem:[#allocation15 + $0x94] sm:$0xf0] }
 0x4a1   :  { %v1767_v33 = vor.u32 %v1903_v2, %v1766_v31  ;;  %v1704_v31 = vld [vmem:[#allocation15 + $0x18] sm:$0xf0]  ;;  %v820_v2 = vperm.slane %v2459_v3, 2 }
 0x4a2   :  { %v810_v58 = vmul.f32 %v1936_v14, %v805_v23  ;;  %1332 = vmatpush.bf16.xpose.msrb.mxu1 %v1731_v51  ;;  %v819_v14 = vperm.slane %v2459_v3, 1  ;;  %1361 = vmatpush.bf16.xpose.msrb.mxu3 %v1723_v9 }
 0x4a3   :  { %1344 = vmatpush.bf16.xpose.msrb.mxu2 %v1767_v33  ;;  %v1707_v33 = vor.u32 %v1885_v26, %v1704_v31 }
 0x4a4   :  { %v2455_v29 = vadd.f32 %v1937_v25, %v810_v58  ;;  %v1887_v25 = vld [vmem:[#allocation15 + $0x14] sm:$0xf0] }
 0x4a6   :  { %v816_v30 = vpack.c.bf16 %v2455_v29, %v2453_v28 }
 0x4a7   :  { %1319 = vmatpush.bf16.xpose.msrb.mxu0 %v1711_v63 }
 0x4a8   :  { %1026 = vmatmul.bf16.vlgmr.msra.gmra.mxu0 %v816_v30  ;;  %1040 = vmatmul.bf16.vlgmr.msra.gmra.mxu1 %v816_v30 }
 0x4a9   :  { %1054 = vmatmul.bf16.vlgmr.msra.gmra.mxu2 %v816_v30  ;;  %1068 = vmatmul.bf16.vlgmr.msra.gmra.mxu3 %v816_v30  ;;  %v1703_v30 = vor.u32 %v1887_v25, %v1702_v24 }
 0x4aa   :  { %1333 = vmatpush.bf16.xpose.msrb.mxu1 %v1715_v1  ;;  %1362 = vmatpush.bf16.xpose.msrb.mxu3 %v1707_v33 }
 0x4ab   :  { %1345 = vmatpush.bf16.xpose.msrb.mxu2 %v1751_v45 }
 0x4af   :  { %1320 = vmatpush.bf16.xpose.msrb.mxu0 %v1695_v15 }
 0x4b2   :  { %1334 = vmatpush.bf16.xpose.msrb.mxu1 %v1699_v19 }
 0x4b3   :  { %1346 = vmatpush.bf16.xpose.msrb.mxu2 %v1735_v56 }
 0x4bb   :  { %1347 = vmatpush.bf16.xpose.msrb.mxu2 %v1719_v7 }
 0x4c3   :  { %1348 = vmatpush.bf16.xpose.msrb.mxu2 %v1703_v30 }
 0x525   :  { %v1027_v20 = vpop.f32.mrf.mxu0  ;;  %v1041_v21 = vpop.f32.mrf.mxu1 }
 0x526   :  { %v2463_v22 = vadd.f32 %v1027_v20, %v818_v13  ;;  %v2465_v23 = vadd.f32 %v1041_v21, %v819_v14 }
 0x528   :  { %v1074_v27 = vmul.f32 %v2463_v22, %v2463_v22  ;;  %v1075_v58 = vmul.f32 %v2465_v23, %v2465_v23 }
 0x52a   :  { %v1082_v34 = vmul.f32 %v1074_v27, %v2463_v22  ;;  %v1083_v35 = vmul.f32 %v1075_v58, %v2465_v23 }
 0x52c   :  { %v1090_v36 = vmul.f32 0.044715, %v1082_v34  ;;  %v1091_v37 = vmul.f32 0.044715, %v1083_v35  ;;  %v1055_v38 = vpop.f32.mrf.mxu2  ;;  %v1069_v39 = vpop.f32.mrf.mxu3 }
 0x52d   :  { %v2475_v40 = vadd.f32 %v1055_v38, %v820_v2  ;;  %v2477_v41 = vadd.f32 %v1069_v39, %v821_v32  ;;  %v1029_v42 = vpop.f32.mrf.mxu0  ;;  %v1043_v43 = vpop.f32.mrf.mxu1 }
 0x52e   :  { %v1098_v44 = vadd.f32 %v1090_v36, %v2463_v22  ;;  %v1099_v45 = vadd.f32 %v1091_v37, %v2465_v23  ;;  %v2481_v46 = vadd.f32 %v1029_v42, %v818_v13  ;;  %v2483_v16 = vadd.f32 %v1043_v43, %v819_v14 }
 0x52f   :  { %v1076_v47 = vmul.f32 %v2475_v40, %v2475_v40  ;;  %v1077_v48 = vmul.f32 %v2477_v41, %v2477_v41 }
 0x530   :  { %v1106_v49 = vmul.f32 0.7978846, %v1098_v44  ;;  %v1078_v50 = vmul.f32 %v2481_v46, %v2481_v46  ;;  %v1079_v17 = vmul.f32 %v2483_v16, %v2483_v16  ;;  %v1107_v54 = vmul.f32 0.7978846, %v1099_v45 }
 0x531   :  { %v1084_v51 = vmul.f32 %v1076_v47, %v2475_v40  ;;  %v1085_v52 = vmul.f32 %v1077_v48, %v2477_v41 }
 0x532   :  { %v1086_v55 = vmul.f32 %v1078_v50, %v2481_v46  ;;  %v1087_v56 = vmul.f32 %v1079_v17, %v2483_v16  ;;  %1955 = vtanh.f32 %v1106_v49 }
 0x533   :  { %v1092_v57 = vmul.f32 0.044715, %v1084_v51  ;;  %v1093_v59 = vmul.f32 0.044715, %v1085_v52  ;;  %1957 = vtanh.f32 %v1107_v54 }
 0x534   :  { %v1094_v60 = vmul.f32 0.044715, %v1086_v55  ;;  %v1095_v61 = vmul.f32 0.044715, %v1087_v56  ;;  %v1057_v62 = vpop.f32.mrf.mxu2  ;;  %v1071_v63 = vpop.f32.mrf.mxu3 }
 0x535   :  { %v1100_v0 = vadd.f32 %v1092_v57, %v2475_v40  ;;  %v1101_v1 = vadd.f32 %v1093_v59, %v2477_v41  ;;  %v1058_v3 = vadd.f32 %v1057_v62, %v820_v2  ;;  %v1072_v4 = vadd.f32 %v1071_v63, %v821_v32  ;;  %v1938_v62 = vld [vmem:[#allocation16] ss:$0 sm:$0xff] }
 0x536   :  { %v1102_v5 = vadd.f32 %v1094_v60, %v2481_v46  ;;  %v1103_v6 = vadd.f32 %v1095_v61, %v2483_v16 }
 0x537   :  { %v1108_v7 = vmul.f32 0.7978846, %v1100_v0  ;;  %v1109_v8 = vmul.f32 0.7978846, %v1101_v1  ;;  %v1080_v9 = vmul.f32 %v1058_v3, %v1058_v3  ;;  %v1081_v10 = vmul.f32 %v1072_v4, %v1072_v4 }
 0x538   :  { %v1110_v11 = vmul.f32 0.7978846, %v1102_v5  ;;  %v1111_v12 = vmul.f32 0.7978846, %v1103_v6  ;;  %v1956_v15 = vpop.eup %1955 }
 0x539   :  { %1959 = vtanh.f32 %v1108_v7  ;;  %v1088_v13 = vmul.f32 %v1080_v9, %v1058_v3  ;;  %v1089_v14 = vmul.f32 %v1081_v10, %v1072_v4  ;;  %v1958_v20 = vpop.eup %1957  ;;  %v1122_v25 = vadd.f32 1.0, %v1956_v15 }
 0x53a   :  { %1961 = vtanh.f32 %v1109_v8  ;;  %v1123_v27 = vadd.f32 1.0, %v1958_v20 }
 0x53b   :  { %1963 = vtanh.f32 %v1110_v11  ;;  %v1096_v18 = vmul.f32 0.044715, %v1088_v13  ;;  %v1097_v19 = vmul.f32 0.044715, %v1089_v14  ;;  %v1130_v33 = vmul.f32 0.5, %v1122_v25 }
 0x53c   :  { %1965 = vtanh.f32 %v1111_v12  ;;  %v1131_v35 = vmul.f32 0.5, %v1123_v27 }
 0x53d   :  { %v1104_v21 = vadd.f32 %v1096_v18, %v1058_v3  ;;  %v1105_v24 = vadd.f32 %v1097_v19, %v1072_v4  ;;  %v1138_v43 = vmul.f32 %v1130_v33, %v2463_v22 }
 0x53e   :  { %v1139_v47 = vmul.f32 %v1131_v35, %v2465_v23 }
 0x53f   :  { %v1960_v26 = vpop.eup %1959  ;;  %v1112_v58 = vmul.f32 0.7978846, %v1104_v21  ;;  %v1113_v30 = vmul.f32 0.7978846, %v1105_v24 }
 0x540   :  { %v1962_v31 = vpop.eup %1961  ;;  %v1124_v37 = vadd.f32 1.0, %v1960_v26 }
 0x541   :  { %v1964_v2 = vpop.eup %1963  ;;  %1967 = vtanh.f32 %v1112_v58  ;;  %v1125_v39 = vadd.f32 1.0, %v1962_v31 }
 0x542   :  { %v1966_v32 = vpop.eup %1965  ;;  %v1126_v34 = vadd.f32 1.0, %v1964_v2  ;;  %1969 = vtanh.f32 %v1113_v30  ;;  %v1132_v50 = vmul.f32 0.5, %v1124_v37 }
 0x543   :  { %v1127_v36 = vadd.f32 1.0, %v1966_v32  ;;  %v1133_v52 = vmul.f32 0.5, %v1125_v39  ;;  %v1939_v39 = vld [vmem:[#allocation18] ss:$0 sm:$0xff] }
 0x544   :  { %v1134_v38 = vmul.f32 0.5, %v1126_v34  ;;  %v1140_v22 = vmul.f32 %v1132_v50, %v2475_v40 }
 0x545   :  { %v1135_v42 = vmul.f32 0.5, %v1127_v36 }
 0x546   :  { %v1142_v44 = vmul.f32 %v1134_v38, %v2481_v46  ;;  %v1141_v46 = vmul.f32 %v1133_v52, %v2477_v41 }
 0x547   :  { %v1968_v45 = vpop.eup %1967  ;;  %v1143_v48 = vmul.f32 %v1135_v42, %v2483_v16 }
 0x548   :  { %v1970_v49 = vpop.eup %1969  ;;  %v1128_v17 = vadd.f32 1.0, %v1968_v45  ;;  %v1146_v51 = vpack.c.bf16 %v1142_v44, %v1138_v43  ;;  %v1940_v44 = vld [vmem:[#allocation19] ss:$0 sm:$0xff] }
 0x549   :  { %v1129_v54 = vadd.f32 1.0, %v1970_v49  ;;  %v1147_v55 = vpack.c.bf16 %v1143_v48, %v1139_v47 }
 0x54a   :  { %v1136_v56 = vmul.f32 0.5, %v1128_v17  ;;  %1321 = vmatmul.bf16.vlgmr.msrb.gmra.mxu0 %v1146_v51 }
 0x54b   :  { %v1137_v57 = vmul.f32 0.5, %v1129_v54  ;;  %1335 = vmatmul.bf16.vlgmr.msrb.gmra.mxu1 %v1147_v55 }
 0x54c   :  { %v1144_v59 = vmul.f32 %v1136_v56, %v1058_v3 }
 0x54d   :  { %v1145_v60 = vmul.f32 %v1137_v57, %v1072_v4 }
 0x54e   :  { %v1148_v23 = vpack.c.bf16 %v1144_v59, %v1140_v22 }
 0x54f   :  { %v1149_v61 = vpack.c.bf16 %v1145_v60, %v1141_v46 }
 0x550   :  { %1349 = vmatmul.bf16.vlgmr.msrb.gmra.mxu2 %v1148_v23 }
 0x551   :  { %1363 = vmatmul.bf16.vlgmr.msrb.gmra.mxu3 %v1149_v61 }
 0x5c7   :  { %v1322_v16 = vpop.f32.mrf.mxu0 }
 0x5c8   :  { %v1323_v63 = vadd.f32 %v1938_v62, %v1322_v16  ;;  %v1336_v0 = vpop.f32.mrf.mxu1 }
 0x5ca   :  { %v1337_v1 = vadd.f32 %v1336_v0, %v1323_v63 }
 0x5cf   :  { %v1324_v5 = vpop.f32.mrf.mxu0 }
 0x5d0   :  { %v1325_v9 = vadd.f32 %v1938_v62, %v1324_v5  ;;  %v1338_v3 = vpop.f32.mrf.mxu1 }
 0x5d2   :  { %v1339_v41 = vadd.f32 %v1338_v3, %v1325_v9 }
 0x5d3   :  { %v1350_v6 = vpop.f32.mrf.mxu2 }
 0x5d4   :  { %v1351_v7 = vadd.f32 %v1350_v6, %v1337_v1  ;;  %v1364_v8 = vpop.f32.mrf.mxu3 }
 0x5d6   :  { %v1365_v10 = vadd.f32 %v1364_v8, %v1351_v7 }
 0x5d8   :  { %v1369_v40 = vadd.f32 %v1365_v10, %v2453_v28 }
 0x5da   :  { %1371 = vadd.xlane.f32.xlu2 %v1369_v40 }
 0x5db   :  { %v1352_v4 = vpop.f32.mrf.mxu2 }
 0x5dc   :  { %v1353_v11 = vadd.f32 %v1352_v4, %v1339_v41  ;;  %v1366_v12 = vpop.f32.mrf.mxu3 }
 0x5de   :  { %v1367_v13 = vadd.f32 %v1366_v12, %v1353_v11 }
 0x5e0   :  { %v1370_v14 = vadd.f32 %v1367_v13, %v2455_v29 }
 0x5e2   :  { %1373 = vadd.xlane.f32.xlu0 %v1370_v14 }
 0x64d   :  { %v1372_v15 = vpop.xlane.xlu2 %1371 }
 0x64e   :  { %v1375_v18 = vmul.f32 %v1372_v15, %v2436_v53 }
 0x650   :  { %v1377_v19 = vsub.f32 %v1369_v40, %v1375_v18 }
 0x652   :  { %v1379_v20 = vmul.f32 %v1377_v19, %v1377_v19 }
 0x654   :  { %1381 = vadd.xlane.f32.xlu1 %v1379_v20 }
 0x655   :  { %v1374_v21 = vpop.xlane.xlu0 %1373 }
 0x656   :  { %v1376_v24 = vmul.f32 %v1374_v21, %v2436_v53 }
 0x658   :  { %v1378_v28 = vsub.f32 %v1370_v14, %v1376_v24 }
 0x65a   :  { %v1380_v25 = vmul.f32 %v1378_v28, %v1378_v28 }
 0x65c   :  { %1383 = vadd.xlane.f32.xlu2 %v1380_v25 }
 0x6c7   :  { %v1382_v26 = vpop.xlane.xlu1 %1381 }
 0x6c8   :  { %v1385_v27 = vmul.f32 %v1382_v26, %v2436_v53 }
 0x6ca   :  { %v1387_v58 = vadd.f32 1e-05, %v1385_v27 }
 0x6cc   :  { %1971 = vrsqrt.f32 %v1387_v58  ;;  %vm1395_vm10 = vweird.f32 %v1387_v58 }
 0x6cf   :  { %v1384_v30 = vpop.xlane.xlu2 %1383 }
 0x6d0   :  { %v1386_v29 = vmul.f32 %v1384_v30, %v2436_v53 }
 0x6d2   :  { %v1972_v31 = vpop.eup %1971  ;;  %v1388_v2 = vadd.f32 1e-05, %v1386_v29 }
 0x6d3   :  { %v1390_v32 = vmul.f32 %v1972_v31, %v1387_v58  ;;  %vm1396_vm9 = vweird.f32 %v1972_v31 }
 0x6d4   :  { %1973 = vrsqrt.f32 %v1388_v2  ;;  %vm1397_vm11 = vmor %vm1395_vm10, %vm1396_vm9  ;;  %vm1405_vm13 = vweird.f32 %v1388_v2 }
 0x6d5   :  { %v1391_v33 = vmul.f32 %v1972_v31, %v1390_v32 }
 0x6d7   :  { %v1392_v34 = vmul.f32 0.5, %v1391_v33 }
 0x6d9   :  { %v1393_v35 = vsub.f32 1.5, %v1392_v34 }
 0x6da   :  { %v1974_v36 = vpop.eup %1973 }
 0x6db   :  { %v1394_v37 = vmul.f32 %v1972_v31, %v1393_v35  ;;  %v1400_v38 = vmul.f32 %v1974_v36, %v1388_v2  ;;  %vm1406_vm12 = vweird.f32 %v1974_v36 }
 0x6dc   :  { %vm1407_vm14 = vmor %vm1405_vm13, %vm1406_vm12 }
 0x6dd   :  { %v1398_v42 = vsel %vm1397_vm11, %v1972_v31, %v1394_v37  ;;  %v1401_v43 = vmul.f32 %v1974_v36, %v1400_v38 }
 0x6de   :  { %v1409_v45 = vmul.f32 %v1398_v42, %v1377_v19 }
 0x6df   :  { %v1402_v47 = vmul.f32 0.5, %v1401_v43 }
 0x6e0   :  { %v1414_v53 = vmul.f32 %v1939_v39, %v1409_v45 }
 0x6e1   :  { %v1403_v48 = vsub.f32 1.5, %v1402_v47 }
 0x6e2   :  { %v1419_v49 = vadd.f32 %v1940_v44, %v1414_v53 }
 0x6e3   :  { %v1404_v50 = vmul.f32 %v1974_v36, %v1403_v48 }
 0x6e4   :  { %1421 = vst [vmem:[%s2533_s14] sm:$0xff] %v1419_v49 }
 0x6e5   :  { %v1408_v17 = vsel %vm1407_vm14, %v1974_v36, %v1404_v50 }
 0x6e6   :  { %v1410_v51 = vmul.f32 %v1408_v17, %v1378_v28 }
 0x6e8   :  { %v1415_v52 = vmul.f32 %v1939_v39, %v1410_v51 }
 0x6ea   :  { %v1420_v54 = vadd.f32 %v1940_v44, %v1415_v52 }
 0x6ec   :  { %1422 = vst [vmem:[%s2533_s14 + $0x8] sm:$0xff] %v1420_v54 }
 0x6ed   :  { %1427 = vsyncpa [#allocation3], 1 }
 0x6ee   :  { %1428 = vsyncpa [#allocation5], 1 }
 0x6ef   :  { %1429 = vsyncpa [#allocation8], 1 }
 0x6f0   :  { %1430 = vsyncpa [#allocation11], 1 }
 0x6f1   :  { %1431 = vsyncpa [#allocation14], 1 }
 0x6f2   :  { %1432 = vsyncpa [#allocation17], 1 }
 0x6f3   :  { %1433 = vsyncpa [#allocation20], 1 }

</bundles_post_ra>
